<compile_context>
chip_gen: v5e
topology: v5e:2x2
jax: 0.10.0
libtpu: 0.0.40
codegen_flags: <defaults>
</compile_context>

<pallas_src>
import functools

import jax
import jax.numpy as jnp
import numpy as np
from jax.experimental import pallas as pl
from jax.experimental.pallas import tpu as pltpu


# ----------------------------------------------------------------------------
# small helpers
# ----------------------------------------------------------------------------
def _row_tile(m, target=256, min_tile=8):
    """Pick a row tile: as big as possible but keep >= ~4 grid steps."""
    tm = target
    while tm > min_tile and m < 4 * tm:
        tm //= 2
    return max(tm, min_tile)


_ERF_A1 = 0.254829592
_ERF_A2 = -0.284496736
_ERF_A3 = 1.421413741
_ERF_A4 = -1.453152027
_ERF_A5 = 1.061405429
_ERF_P = 0.3275911


def _erf_approx(x):
    """Abramowitz & Stegun 7.1.26 erf approximation (|err| < 1.5e-7)."""
    ax = jnp.abs(x)
    t = 1.0 / (1.0 + _ERF_P * ax)
    poly = ((((_ERF_A5 * t + _ERF_A4) * t + _ERF_A3) * t + _ERF_A2) * t + _ERF_A1) * t
    y = 1.0 - poly * jnp.exp(-ax * ax)
    return jnp.where(x >= 0, y, -y)


def _gelu(x):
    """Exact (erf-based) GELU, matching torch.nn.GELU(approximate='none')."""
    return 0.5 * x * (1.0 + _erf_approx(x * 0.7071067811865476))


def _relative_position_bias(table, window_size, num_heads):
    """Reproduce WindowMSA's relative-position-bias gather. -> (heads, N, N)."""
    Wh = Ww = window_size
    seq1 = np.arange(0, (2 * Ww - 1) * Wh, 2 * Ww - 1)
    seq2 = np.arange(0, Ww, 1)
    rel = (seq1[:, None] + seq2[None, :]).reshape(1, -1)  # (1, N)
    idx = rel + rel.T                                     # (N, N)
    idx = np.ascontiguousarray(idx[:, ::-1])              # torch .flip(1)
    N = Wh * Ww
    bias = table[idx.reshape(-1)]                         # (N*N, heads)
    bias = bias.reshape(N, N, num_heads)
    return jnp.transpose(bias, (2, 0, 1)).astype(jnp.float32)


def _shift_attn_mask(Hp, Wp, ws, shift_size):
    """Shifted-window attention mask, same construction as ShiftWindowMSA."""
    img = np.zeros((Hp, Wp), np.float32)
    h_slices = (slice(0, -ws), slice(-ws, -shift_size), slice(-shift_size, None))
    w_slices = (slice(0, -ws), slice(-ws, -shift_size), slice(-shift_size, None))
    cnt = 0
    for hs in h_slices:
        for wsl in w_slices:
            img[hs, wsl] = cnt
            cnt += 1
    nWh, nWw = Hp // ws, Wp // ws
    mw = img.reshape(nWh, ws, nWw, ws).transpose(0, 2, 1, 3).reshape(-1, ws * ws)
    am = mw[:, None, :] - mw[:, :, None]
    am = np.where(am != 0, -100.0, 0.0).astype(np.float32)
    return jnp.asarray(am)                                # (nW, N, N)


# ----------------------------------------------------------------------------
# Kernel 1: LayerNorm + matmul + bias   (used for norm1 + QKV projection)
# ----------------------------------------------------------------------------
def _ln_matmul_kernel(x_ref, w_ref, b_ref, g_ref, beta_ref, o_ref, *, eps, dot_dtype):
    x = x_ref[...].astype(jnp.float32)                     # (TM, C)
    mean = jnp.mean(x, axis=-1, keepdims=True)
    xc = x - mean
    var = jnp.mean(xc * xc, axis=-1, keepdims=True)
    xn = xc * jax.lax.rsqrt(var + eps)
    xn = xn * g_ref[...].astype(jnp.float32) + beta_ref[...].astype(jnp.float32)
    acc = jnp.dot(xn.astype(dot_dtype), w_ref[...],
                  preferred_element_type=jnp.float32)      # (TM, D)
    o_ref[...] = (acc + b_ref[...].astype(jnp.float32)).astype(o_ref.dtype)


def _ln_matmul(rows, w_t, bias, gamma, beta, *, eps, dot_dtype, tm_target=256):
    M, C = rows.shape
    D = w_t.shape[1]
    tm = _row_tile(M, tm_target)
    Mp = pl.cdiv(M, tm) * tm
    if Mp != M:
        rows = jnp.pad(rows, ((0, Mp - M), (0, 0)))
    kern = functools.partial(_ln_matmul_kernel, eps=eps, dot_dtype=dot_dtype)
    out = pl.pallas_call(
        kern,
        out_shape=jax.ShapeDtypeStruct((Mp, D), jnp.float32),
        grid_spec=pltpu.PrefetchScalarGridSpec(
            num_scalar_prefetch=0,
            grid=(Mp // tm,),
            in_specs=[
                pl.BlockSpec((tm, C), lambda i: (i, 0)),   # row tile
                pl.BlockSpec((C, D), lambda i: (0, 0)),    # weight (resident)
                pl.BlockSpec((1, D), lambda i: (0, 0)),    # bias
                pl.BlockSpec((1, C), lambda i: (0, 0)),    # LN gamma
                pl.BlockSpec((1, C), lambda i: (0, 0)),    # LN beta
            ],
            out_specs=pl.BlockSpec((tm, D), lambda i: (i, 0)),
        ),
        compiler_params=pltpu.CompilerParams(dimension_semantics=("parallel",)),
    )(rows, w_t.astype(dot_dtype), bias.reshape(1, D),
      gamma.reshape(1, C), beta.reshape(1, C))
    return out[:M]


# ----------------------------------------------------------------------------
# Kernel 2: window multi-head attention + output projection
# ----------------------------------------------------------------------------
def _window_attn_kernel(qkv_ref, bias_ref, mask_ref, wp_ref, bp_ref, o_ref,
                        *, num_heads, head_dim, scale, dot_dtype):
    C = num_heads * head_dim
    qkv = qkv_ref[...].astype(jnp.float32)                 # (B, N, 3C)
    Bb, N, _ = qkv.shape
    mask = mask_ref[...].astype(jnp.float32)               # (N, N)
    q = qkv[..., 0 * C:1 * C]
    k = qkv[..., 1 * C:2 * C]
    v = qkv[..., 2 * C:3 * C]

    head_out = []
    for h in range(num_heads):                             # static unroll
        sl = slice(h * head_dim, (h + 1) * head_dim)
        qh = q[..., sl].astype(dot_dtype)
        kh = k[..., sl].astype(dot_dtype)
        vh = v[..., sl].astype(dot_dtype)
        s = jnp.einsum('bnd,bmd->bnm', qh, kh,
                       preferred_element_type=jnp.float32)  # (B, N, N)
        s = s * scale + bias_ref[h].astype(jnp.float32)[None] + mask[None]
        s = s - jnp.max(s, axis=-1, keepdims=True)
        p = jnp.exp(s)
        p = p / jnp.sum(p, axis=-1, keepdims=True)
        head_out.append(jnp.einsum('bnm,bmd->bnd', p.astype(dot_dtype), vh,
                                   preferred_element_type=jnp.float32))
    attn = jnp.concatenate(head_out, axis=-1)               # (B, N, C), f32

    attn2 = attn.reshape(Bb * N, C)                         # N is 8-aligned
    proj = jnp.dot(attn2.astype(dot_dtype), wp_ref[...],
                   preferred_element_type=jnp.float32)
    proj = proj + bp_ref[...].astype(jnp.float32)
    o_ref[...] = proj.reshape(Bb, N, C).astype(o_ref.dtype)


def _window_attention(qkv, rel_bias, attn_mask, proj_w_t, proj_b,
                      *, num_heads, head_dim, scale, dot_dtype):
    nW, B, N, threeC = qkv.shape
    C = num_heads * head_dim
    kern = functools.partial(_window_attn_kernel, num_heads=num_heads,
                             head_dim=head_dim, scale=scale, dot_dtype=dot_dtype)
    out = pl.pallas_call(
        kern,
        out_shape=jax.ShapeDtypeStruct((nW, B, N, C), jnp.float32),
        grid_spec=pltpu.PrefetchScalarGridSpec(
            num_scalar_prefetch=0,
            grid=(nW,),
            in_specs=[
                pl.BlockSpec((None, B, N, threeC), lambda i: (i, 0, 0, 0)),
                pl.BlockSpec((num_heads, N, N), lambda i: (0, 0, 0)),
                pl.BlockSpec((None, N, N), lambda i: (i, 0, 0)),
                pl.BlockSpec((C, C), lambda i: (0, 0)),
                pl.BlockSpec((1, C), lambda i: (0, 0)),
            ],
            out_specs=pl.BlockSpec((None, B, N, C), lambda i: (i, 0, 0, 0)),
        ),
        compiler_params=pltpu.CompilerParams(dimension_semantics=("parallel",)),
    )(qkv, rel_bias, attn_mask, proj_w_t.astype(dot_dtype), proj_b.reshape(1, C))
    return out


# ----------------------------------------------------------------------------
# Kernel 3: residual + LayerNorm + FC1 + GELU + FC2 + bias + residual
# ----------------------------------------------------------------------------
def _ffn_kernel(x_ref, res_ref, w1_ref, b1_ref, w2_ref, b2_ref, g_ref, beta_ref,
                o_ref, *, eps, dot_dtype):
    h = x_ref[...].astype(jnp.float32) + res_ref[...].astype(jnp.float32)
    mean = jnp.mean(h, axis=-1, keepdims=True)
    hc = h - mean
    var = jnp.mean(hc * hc, axis=-1, keepdims=True)
    hn = hc * jax.lax.rsqrt(var + eps)
    hn = hn * g_ref[...].astype(jnp.float32) + beta_ref[...].astype(jnp.float32)
    a = jnp.dot(hn.astype(dot_dtype), w1_ref[...],
                preferred_element_type=jnp.float32)
    a = a + b1_ref[...].astype(jnp.float32)
    a = _gelu(a)
    y = jnp.dot(a.astype(dot_dtype), w2_ref[...],
                preferred_element_type=jnp.float32)
    y = y + b2_ref[...].astype(jnp.float32)
    o_ref[...] = (y + h).astype(o_ref.dtype)


def _ffn(x_rows, res_rows, gamma, beta, w1_t, b1, w2_t, b2,
         *, eps, dot_dtype, tm_target=256):
    M, C = x_rows.shape
    FF = w1_t.shape[1]
    tm = _row_tile(M, tm_target)
    Mp = pl.cdiv(M, tm) * tm
    if Mp != M:
        pad = ((0, Mp - M), (0, 0))
        x_rows = jnp.pad(x_rows, pad)
        res_rows = jnp.pad(res_rows, pad)
    kern = functools.partial(_ffn_kernel, eps=eps, dot_dtype=dot_dtype)
    out = pl.pallas_call(
        kern,
        out_shape=jax.ShapeDtypeStruct((Mp, C), jnp.float32),
        grid_spec=pltpu.PrefetchScalarGridSpec(
            num_scalar_prefetch=0,
            grid=(Mp // tm,),
            in_specs=[
                pl.BlockSpec((tm, C), lambda i: (i, 0)),   # attention output rows
                pl.BlockSpec((tm, C), lambda i: (i, 0)),   # residual (block input) rows
                pl.BlockSpec((C, FF), lambda i: (0, 0)),   # W1 (resident)
                pl.BlockSpec((1, FF), lambda i: (0, 0)),   # b1
                pl.BlockSpec((FF, C), lambda i: (0, 0)),   # W2 (resident)
                pl.BlockSpec((1, C), lambda i: (0, 0)),    # b2
                pl.BlockSpec((1, C), lambda i: (0, 0)),    # LN gamma
                pl.BlockSpec((1, C), lambda i: (0, 0)),    # LN beta
            ],
            out_specs=pl.BlockSpec((tm, C), lambda i: (i, 0)),
        ),
        compiler_params=pltpu.CompilerParams(dimension_semantics=("parallel",)),
    )(x_rows, res_rows, w1_t.astype(dot_dtype), b1.reshape(1, FF),
      w2_t.astype(dot_dtype), b2.reshape(1, C),
      gamma.reshape(1, C), beta.reshape(1, C))
    return out[:M]


# ----------------------------------------------------------------------------
# SwinBlock forward (Pallas kernels + reshape/roll glue)
# ----------------------------------------------------------------------------
def swin_block_forward(x, params, *, hw_shape, num_heads, window_size, shift,
                       eps=1e-5, dot_dtype=jnp.bfloat16):
    B, L, C = x.shape
    H, W = hw_shape
    if L != H * W:
        raise ValueError("input feature has wrong size")
    ws = window_size
    shift_size = ws // 2 if shift else 0
    hd = C // num_heads
    scale = hd ** -0.5

    rows = x.reshape(B * L, C).astype(jnp.float32)

    # --- norm1 + QKV projection (fused, K1). LN commutes with the window
    #     reordering, so it is applied per-token before partitioning. ---
    qkv = _ln_matmul(rows, params['qkv_w'].T, params['qkv_b'],
                     params['ln1_g'], params['ln1_b'],
                     eps=eps, dot_dtype=dot_dtype)          # (B*L, 3C), f32
    qkv = qkv.reshape(B, H, W, 3 * C)

    # --- pad to a multiple of the window size. A padded token is zero after
    #     norm1 in the reference, so its QKV value is exactly the QKV bias. ---
    pad_r = (ws - W % ws) % ws
    pad_b = (ws - H % ws) % ws
    Hp, Wp = H + pad_b, W + pad_r
    if pad_r or pad_b:
        qkv = jnp.pad(qkv, ((0, 0), (0, pad_b), (0, pad_r), (0, 0)))
        real = jnp.zeros((1, Hp, Wp, 1), jnp.float32).at[:, :H, :W, :].set(1.0)
        qkv = qkv + (1.0 - real) * params['qkv_b'].astype(jnp.float32)

    # --- cyclic shift ---
    if shift_size > 0:
        qkv = jnp.roll(qkv, shift=(-shift_size, -shift_size), axis=(1, 2))

    # --- window partition, window-position-major so every grid step of the
    #     attention kernel shares a single shift mask ---
    nWh, nWw = Hp // ws, Wp // ws
    nW = nWh * nWw
    N = ws * ws
    qkv = qkv.reshape(B, nWh, ws, nWw, ws, 3 * C)
    qkv = jnp.transpose(qkv, (1, 3, 0, 2, 4, 5)).reshape(nW, B, N, 3 * C)

    rel_bias = _relative_position_bias(params['rel_pos_table'], ws, num_heads)
    if shift_size > 0:
        attn_mask = _shift_attn_mask(Hp, Wp, ws, shift_size)
    else:
        attn_mask = jnp.zeros((nW, N, N), jnp.float32)

    # --- window attention + output projection (fused, K2) ---
    attn = _window_attention(qkv, rel_bias, attn_mask,
                             params['proj_w'].T, params['proj_b'],
                             num_heads=num_heads, head_dim=hd, scale=scale,
                             dot_dtype=dot_dtype)           # (nW, B, N, C)

    # --- window reverse + reverse shift + crop ---
    y = attn.reshape(nWh, nWw, B, ws, ws, C)
    y = jnp.transpose(y, (2, 0, 3, 1, 4, 5)).reshape(B, Hp, Wp, C)
    if shift_size > 0:
        y = jnp.roll(y, shift=(shift_size, shift_size), axis=(1, 2))
    y = y[:, :H, :W, :].reshape(B * L, C)

    # --- residual + norm2 + FFN(GELU) + residual (fused, K3) ---
    out = _ffn(y, rows, params['ln2_g'], params['ln2_b'],
               params['fc1_w'].T, params['fc1_b'],
               params['fc2_w'].T, params['fc2_b'],
               eps=eps, dot_dtype=dot_dtype)
    return out.reshape(B, L, C)


# ----------------------------------------------------------------------------
# Pure-JAX reference (mirrors the torch module op-by-op) for verification.
# ----------------------------------------------------------------------------
def _layer_norm_ref(x, g, b, eps):
    mean = jnp.mean(x, axis=-1, keepdims=True)
    var = jnp.mean((x - mean) ** 2, axis=-1, keepdims=True)
    return (x - mean) * jax.lax.rsqrt(var + eps) * g + b


def swin_block_reference(x, params, *, hw_shape, num_heads, window_size, shift,
                         eps=1e-5):
    B, L, C = x.shape
    H, W = hw_shape
    ws = window_size
    shift_size = ws // 2 if shift else 0
    hd = C // num_heads
    scale = hd ** -0.5
    hi = jax.lax.Precision.HIGHEST
    mm = lambda a, b: jnp.matmul(a, b, precision=hi)

    identity = x
    q = _layer_norm_ref(x, params['ln1_g'], params['ln1_b'], eps)
    q = q.reshape(B, H, W, C)
    pad_r = (ws - W % ws) % ws
    pad_b = (ws - H % ws) % ws
    q = jnp.pad(q, ((0, 0), (0, pad_b), (0, pad_r), (0, 0)))
    Hp, Wp = H + pad_b, W + pad_r
    if shift_size > 0:
        q = jnp.roll(q, (-shift_size, -shift_size), axis=(1, 2))
        attn_mask = _shift_attn_mask(Hp, Wp, ws, shift_size)
    else:
        attn_mask = None
    nWh, nWw = Hp // ws, Wp // ws
    nW = nWh * nWw
    N = ws * ws
    qw = q.reshape(B, nWh, ws, nWw, ws, C)
    qw = jnp.transpose(qw, (0, 1, 3, 2, 4, 5)).reshape(B * nW, N, C)

    qkv = mm(qw, params['qkv_w'].T) + params['qkv_b']
    qkv = qkv.reshape(B * nW, N, 3, num_heads, hd)
    qkv = jnp.transpose(qkv, (2, 0, 3, 1, 4))
    qh, kh, vh = qkv[0], qkv[1], qkv[2]
    qh = qh * scale
    attn = jnp.einsum('bhnd,bhmd->bhnm', qh, kh, precision=hi)
    rel_bias = _relative_position_bias(params['rel_pos_table'], ws, num_heads)
    attn = attn + rel_bias[None]
    if attn_mask is not None:
        attn = attn.reshape(B, nW, num_heads, N, N) + attn_mask[None, :, None]
        attn = attn.reshape(B * nW, num_heads, N, N)
    attn = jax.nn.softmax(attn, axis=-1)
    out = jnp.einsum('bhnm,bhmd->bhnd', attn, vh, precision=hi)
    out = jnp.transpose(out, (0, 2, 1, 3)).reshape(B * nW, N, C)
    out = mm(out, params['proj_w'].T) + params['proj_b']

    out = out.reshape(B, nWh, nWw, ws, ws, C)
    out = jnp.transpose(out, (0, 1, 3, 2, 4, 5)).reshape(B, Hp, Wp, C)
    if shift_size > 0:
        out = jnp.roll(out, (shift_size, shift_size), axis=(1, 2))
    out = out[:, :H, :W, :].reshape(B, H * W, C)

    x1 = identity + out
    h = _layer_norm_ref(x1, params['ln2_g'], params['ln2_b'], eps)
    h = mm(h, params['fc1_w'].T) + params['fc1_b']
    h = jax.nn.gelu(h, approximate=False)
    h = mm(h, params['fc2_w'].T) + params['fc2_b']
    return x1 + h


# ----------------------------------------------------------------------------
# test
# ----------------------------------------------------------------------------
if __name__ == "__main__":
    C = 32
    num_heads = 4
    ff = 64
    ws = 4
    B = 2

    key = jax.random.PRNGKey(0)
    keys = jax.random.split(key, 16)

    def rnd(k, shape, s):
        return jax.random.normal(k, shape, dtype=jnp.float32) * s

    params = {
        "ln1_g": 1.0 + rnd(keys[0], (C,), 0.05),
        "ln1_b": rnd(keys[1], (C,), 0.05),
        "qkv_w": rnd(keys[2], (3 * C, C), 0.18),     # torch Linear layout (out, in)
        "qkv_b": rnd(keys[3], (3 * C,), 0.1),
        "rel_pos_table": rnd(keys[4], ((2 * ws - 1) ** 2, num_heads), 0.5),
        "proj_w": rnd(keys[5], (C, C), 0.18),
        "proj_b": rnd(keys[6], (C,), 0.1),
        "ln2_g": 1.0 + rnd(keys[7], (C,), 0.05),
        "ln2_b": rnd(keys[8], (C,), 0.05),
        "fc1_w": rnd(keys[9], (ff, C), 0.18),
        "fc1_b": rnd(keys[10], (ff,), 0.1),
        "fc2_w": rnd(keys[11], (C, ff), 0.12),
        "fc2_b": rnd(keys[12], (C,), 0.1),
    }

    fwd = jax.jit(swin_block_forward,
                  static_argnames=("hw_shape", "num_heads", "window_size",
                                   "shift", "eps", "dot_dtype"))

    configs = [
        # (hw_shape, shift, dot_dtype, tolerance)
        ((8, 8), True, jnp.float32, 2e-2),    # shifted windows, f32 MXU path
        ((8, 8), True, jnp.bfloat16, 5e-2),   # shifted windows, bf16 MXU path
        ((7, 7), False, jnp.float32, 2e-2),   # window padding + no-shift path
    ]

    for hw_shape, shift, dot_dtype, tol in configs:
        H, W = hw_shape
        L = H * W
        x = jax.random.normal(keys[13], (B, L, C), dtype=jnp.float32)

        out = fwd(x, params, hw_shape=hw_shape, num_heads=num_heads,
                  window_size=ws, shift=shift, dot_dtype=dot_dtype)
        out = jax.block_until_ready(out)

        ref = swin_block_reference(x, params, hw_shape=hw_shape,
                                   num_heads=num_heads, window_size=ws,
                                   shift=shift)
        ref = jax.block_until_ready(ref)

        assert out.shape == (B, L, C), out.shape
        np.testing.assert_allclose(np.asarray(out), np.asarray(ref),
                                   rtol=tol, atol=tol)

    print("KERNEL_OK")
</pallas_src>

<mosaic_0001>
module attributes {stable_mosaic.version = 11 : i64} {
  func.func @_ln_matmul_kernel(%arg0: i32, %arg1: memref<32x32xf32, #tpu.memory_space<vmem>>, %arg2: memref<32x96xf32, #tpu.memory_space<vmem>>, %arg3: memref<1x96xf32, #tpu.memory_space<vmem>>, %arg4: memref<1x32xf32, #tpu.memory_space<vmem>>, %arg5: memref<1x32xf32, #tpu.memory_space<vmem>>, %arg6: memref<32x96xf32, #tpu.memory_space<vmem>>) attributes {dimension_semantics = [#tpu.dimension_semantics<parallel>], iteration_bounds = array<i64: 4>, scalar_prefetch = 0 : i64, scratch_operands = 0 : i64, tpu.core_type = #tpu.core_type<tc>, window_params = [{transform_indices = @transform_0, window_bounds = array<i64: 32, 32>}, {pipeline_mode = #tpu.pipeline_mode<synchronous>, transform_indices = @transform_1, window_bounds = array<i64: 32, 96>}, {pipeline_mode = #tpu.pipeline_mode<synchronous>, transform_indices = @transform_2, window_bounds = array<i64: 1, 96>}, {pipeline_mode = #tpu.pipeline_mode<synchronous>, transform_indices = @transform_3, window_bounds = array<i64: 1, 32>}, {pipeline_mode = #tpu.pipeline_mode<synchronous>, transform_indices = @transform_4, window_bounds = array<i64: 1, 32>}, {transform_indices = @transform_5, window_bounds = array<i64: 32, 96>}]} {
    %c0 = arith.constant 0 : index
    %c0_0 = arith.constant 0 : index
    %0 = vector.load %arg1[%c0, %c0_0] : memref<32x32xf32, #tpu.memory_space<vmem>>, vector<32x32xf32>
    %cst = arith.constant dense<0.000000e+00> : vector<32xf32>
    %1 = vector.multi_reduction <add>, %0, %cst [1] : vector<32x32xf32> to vector<32xf32>
    %2 = vector.shape_cast %1 : vector<32xf32> to vector<32x1xf32>
    %cst_1 = arith.constant 3.200000e+01 : f32
    %3 = vector.broadcast %cst_1 : f32 to vector<32x1xf32>
    %4 = arith.divf %2, %3 : vector<32x1xf32>
    %5 = vector.broadcast %4 : vector<32x1xf32> to vector<32x32xf32>
    %6 = arith.subf %0, %5 : vector<32x32xf32>
    %7 = arith.mulf %6, %6 : vector<32x32xf32>
    %cst_2 = arith.constant dense<0.000000e+00> : vector<32xf32>
    %8 = vector.multi_reduction <add>, %7, %cst_2 [1] : vector<32x32xf32> to vector<32xf32>
    %9 = vector.shape_cast %8 : vector<32xf32> to vector<32x1xf32>
    %cst_3 = arith.constant 3.200000e+01 : f32
    %10 = vector.broadcast %cst_3 : f32 to vector<32x1xf32>
    %11 = arith.divf %9, %10 : vector<32x1xf32>
    %cst_4 = arith.constant 9.99999974E-6 : f32
    %12 = vector.broadcast %cst_4 : f32 to vector<32x1xf32>
    %13 = arith.addf %11, %12 : vector<32x1xf32>
    %14 = math.rsqrt %13 : vector<32x1xf32>
    %15 = vector.broadcast %14 : vector<32x1xf32> to vector<32x32xf32>
    %16 = arith.mulf %6, %15 : vector<32x32xf32>
    %c0_5 = arith.constant 0 : index
    %c0_6 = arith.constant 0 : index
    %17 = vector.load %arg4[%c0_5, %c0_6] : memref<1x32xf32, #tpu.memory_space<vmem>>, vector<1x32xf32>
    %18 = vector.broadcast %17 : vector<1x32xf32> to vector<32x32xf32>
    %19 = arith.mulf %16, %18 : vector<32x32xf32>
    %c0_7 = arith.constant 0 : index
    %c0_8 = arith.constant 0 : index
    %20 = vector.load %arg5[%c0_7, %c0_8] : memref<1x32xf32, #tpu.memory_space<vmem>>, vector<1x32xf32>
    %21 = vector.broadcast %20 : vector<1x32xf32> to vector<32x32xf32>
    %22 = arith.addf %19, %21 : vector<32x32xf32>
    %c0_9 = arith.constant 0 : index
    %c0_10 = arith.constant 0 : index
    %23 = vector.load %arg2[%c0_9, %c0_10] : memref<32x96xf32, #tpu.memory_space<vmem>>, vector<32x96xf32>
    %cst_11 = arith.constant dense<0.000000e+00> : vector<32x96xf32>
    %24 = tpu.matmul %22, %23, %cst_11 {dimension_numbers = #tpu.dot_dimension_numbers<[1], [0], [0], [1], [0, 0, 1, 1], [], []>} : vector<32x32xf32>, vector<32x96xf32>, vector<32x96xf32> -> vector<32x96xf32>
    %c0_12 = arith.constant 0 : index
    %c0_13 = arith.constant 0 : index
    %25 = vector.load %arg3[%c0_12, %c0_13] : memref<1x96xf32, #tpu.memory_space<vmem>>, vector<1x96xf32>
    %26 = vector.broadcast %25 : vector<1x96xf32> to vector<32x96xf32>
    %27 = arith.addf %24, %26 : vector<32x96xf32>
    %c0_14 = arith.constant 0 : index
    %c0_15 = arith.constant 0 : index
    %28 = vector.load %arg6[%c0_14, %c0_15] : memref<32x96xf32, #tpu.memory_space<vmem>>, vector<32x96xf32>
    tpu.vector_store %arg6[%c0_14, %c0_15], %27 {strides = array<i32>} : memref<32x96xf32, #tpu.memory_space<vmem>>, vector<32x96xf32>,
    return
  }
  func.func @transform_0(%arg0: i32) -> (i32, i32) {
    %c0_i32 = arith.constant 0 : i32
    %c0_i32_0 = arith.constant 0 : i32
    return %arg0, %c0_i32 : i32, i32
  }
  func.func @transform_1(%arg0: i32) -> (i32, i32) {
    %c0_i32 = arith.constant 0 : i32
    %c0_i32_0 = arith.constant 0 : i32
    %c0_i32_1 = arith.constant 0 : i32
    return %c0_i32, %c0_i32_0 : i32, i32
  }
  func.func @transform_2(%arg0: i32) -> (i32, i32) {
    %c0_i32 = arith.constant 0 : i32
    %c0_i32_0 = arith.constant 0 : i32
    %c0_i32_1 = arith.constant 0 : i32
    return %c0_i32, %c0_i32_0 : i32, i32
  }
  func.func @transform_3(%arg0: i32) -> (i32, i32) {
    %c0_i32 = arith.constant 0 : i32
    %c0_i32_0 = arith.constant 0 : i32
    %c0_i32_1 = arith.constant 0 : i32
    return %c0_i32, %c0_i32_0 : i32, i32
  }
  func.func @transform_4(%arg0: i32) -> (i32, i32) {
    %c0_i32 = arith.constant 0 : i32
    %c0_i32_0 = arith.constant 0 : i32
    %c0_i32_1 = arith.constant 0 : i32
    return %c0_i32, %c0_i32_0 : i32, i32
  }
  func.func @transform_5(%arg0: i32) -> (i32, i32) {
    %c0_i32 = arith.constant 0 : i32
    %c0_i32_0 = arith.constant 0 : i32
    return %arg0, %c0_i32 : i32, i32
  }
}

module attributes {stable_mosaic.version = 11 : i64} {
  func.func @_window_attn_kernel(%arg0: i32, %arg1: memref<1x2x16x96xf32, #tpu.memory_space<vmem>>, %arg2: memref<4x16x16xf32, #tpu.memory_space<vmem>>, %arg3: memref<1x16x16xf32, #tpu.memory_space<vmem>>, %arg4: memref<32x32xf32, #tpu.memory_space<vmem>>, %arg5: memref<1x32xf32, #tpu.memory_space<vmem>>, %arg6: memref<1x2x16x32xf32, #tpu.memory_space<vmem>>) attributes {dimension_semantics = [#tpu.dimension_semantics<parallel>], iteration_bounds = array<i64: 4>, scalar_prefetch = 0 : i64, scratch_operands = 0 : i64, tpu.core_type = #tpu.core_type<tc>, window_params = [{transform_indices = @transform_0, window_bounds = array<i64: 1, 2, 16, 96>}, {pipeline_mode = #tpu.pipeline_mode<synchronous>, transform_indices = @transform_1, window_bounds = array<i64: 4, 16, 16>}, {transform_indices = @transform_2, window_bounds = array<i64: 1, 16, 16>}, {pipeline_mode = #tpu.pipeline_mode<synchronous>, transform_indices = @transform_3, window_bounds = array<i64: 32, 32>}, {pipeline_mode = #tpu.pipeline_mode<synchronous>, transform_indices = @transform_4, window_bounds = array<i64: 1, 32>}, {transform_indices = @transform_5, window_bounds = array<i64: 1, 2, 16, 32>}]} {
    %c0 = arith.constant 0 : index
    %c0_0 = arith.constant 0 : index
    %c0_1 = arith.constant 0 : index
    %c0_2 = arith.constant 0 : index
    %0 = vector.load %arg1[%c0, %c0_0, %c0_1, %c0_2] : memref<1x2x16x96xf32, #tpu.memory_space<vmem>>, vector<1x2x16x96xf32>
    %1 = vector.shape_cast %0 : vector<1x2x16x96xf32> to vector<2x16x96xf32>
    %c0_3 = arith.constant 0 : index
    %c0_4 = arith.constant 0 : index
    %c0_5 = arith.constant 0 : index
    %2 = vector.load %arg3[%c0_3, %c0_4, %c0_5] : memref<1x16x16xf32, #tpu.memory_space<vmem>>, vector<1x16x16xf32>
    %3 = vector.shape_cast %2 : vector<1x16x16xf32> to vector<16x16xf32>
    %4 = vector.extract_strided_slice %1 {offsets = [0, 0, 0], sizes = [2, 16, 32], strides = [1, 1, 1]} : vector<2x16x96xf32> to vector<2x16x32xf32>
    %5 = vector.extract_strided_slice %1 {offsets = [0, 0, 32], sizes = [2, 16, 32], strides = [1, 1, 1]} : vector<2x16x96xf32> to vector<2x16x32xf32>
    %6 = vector.extract_strided_slice %1 {offsets = [0, 0, 64], sizes = [2, 16, 32], strides = [1, 1, 1]} : vector<2x16x96xf32> to vector<2x16x32xf32>
    %7 = vector.extract_strided_slice %4 {offsets = [0, 0, 0], sizes = [2, 16, 8], strides = [1, 1, 1]} : vector<2x16x32xf32> to vector<2x16x8xf32>
    %8 = vector.extract_strided_slice %5 {offsets = [0, 0, 0], sizes = [2, 16, 8], strides = [1, 1, 1]} : vector<2x16x32xf32> to vector<2x16x8xf32>
    %9 = vector.extract_strided_slice %6 {offsets = [0, 0, 0], sizes = [2, 16, 8], strides = [1, 1, 1]} : vector<2x16x32xf32> to vector<2x16x8xf32>
    "tpu.trace_start"() <{level = 10 : i32, message = "bnd,bmd->bnm"}> : () -> ()
    %cst = arith.constant dense<0.000000e+00> : vector<2x16x16xf32>
    %10 = tpu.matmul %7, %8, %cst {dimension_numbers = #tpu.dot_dimension_numbers<[2], [2], [1], [1], [0, 0, 0, 1, 1, 1], [0], [0]>} : vector<2x16x8xf32>, vector<2x16x8xf32>, vector<2x16x16xf32> -> vector<2x16x16xf32>
    "tpu.trace_stop"() : () -> ()
    %cst_6 = arith.constant 0.353553385 : f32
    %11 = vector.broadcast %cst_6 : f32 to vector<2x16x16xf32>
    %12 = arith.mulf %10, %11 : vector<2x16x16xf32>
    %c0_7 = arith.constant 0 : index
    %c0_8 = arith.constant 0 : index
    %c0_9 = arith.constant 0 : index
    %13 = vector.load %arg2[%c0_7, %c0_8, %c0_9] : memref<4x16x16xf32, #tpu.memory_space<vmem>>, vector<1x16x16xf32>
    %14 = vector.shape_cast %13 : vector<1x16x16xf32> to vector<16x16xf32>
    %15 = vector.shape_cast %14 : vector<16x16xf32> to vector<1x16x16xf32>
    %16 = vector.broadcast %15 : vector<1x16x16xf32> to vector<2x16x16xf32>
    %17 = arith.addf %12, %16 : vector<2x16x16xf32>
    %18 = vector.shape_cast %3 : vector<16x16xf32> to vector<1x16x16xf32>
    %19 = vector.broadcast %18 : vector<1x16x16xf32> to vector<2x16x16xf32>
    %20 = arith.addf %17, %19 : vector<2x16x16xf32>
    %cst_10 = arith.constant dense<0xFF800000> : vector<2x16xf32>
    %21 = vector.multi_reduction <maximumf>, %20, %cst_10 [2] : vector<2x16x16xf32> to vector<2x16xf32>
    %22 = vector.shape_cast %21 : vector<2x16xf32> to vector<2x16x1xf32>
    %23 = vector.broadcast %22 : vector<2x16x1xf32> to vector<2x16x16xf32>
    %24 = arith.subf %20, %23 : vector<2x16x16xf32>
    %25 = math.exp %24 : vector<2x16x16xf32>
    %cst_11 = arith.constant dense<0.000000e+00> : vector<2x16xf32>
    %26 = vector.multi_reduction <add>, %25, %cst_11 [2] : vector<2x16x16xf32> to vector<2x16xf32>
    %27 = vector.shape_cast %26 : vector<2x16xf32> to vector<2x16x1xf32>
    %28 = vector.broadcast %27 : vector<2x16x1xf32> to vector<2x16x16xf32>
    %29 = arith.divf %25, %28 : vector<2x16x16xf32>
    "tpu.trace_start"() <{level = 10 : i32, message = "bnm,bmd->bnd"}> : () -> ()
    %cst_12 = arith.constant dense<0.000000e+00> : vector<2x16x8xf32>
    %30 = tpu.matmul %29, %9, %cst_12 {dimension_numbers = #tpu.dot_dimension_numbers<[2], [1], [1], [2], [0, 0, 0, 1, 1, 2], [0], [0]>} : vector<2x16x16xf32>, vector<2x16x8xf32>, vector<2x16x8xf32> -> vector<2x16x8xf32>
    "tpu.trace_stop"() : () -> ()
    %31 = vector.extract_strided_slice %4 {offsets = [0, 0, 8], sizes = [2, 16, 8], strides = [1, 1, 1]} : vector<2x16x32xf32> to vector<2x16x8xf32>
    %32 = vector.extract_strided_slice %5 {offsets = [0, 0, 8], sizes = [2, 16, 8], strides = [1, 1, 1]} : vector<2x16x32xf32> to vector<2x16x8xf32>
    %33 = vector.extract_strided_slice %6 {offsets = [0, 0, 8], sizes = [2, 16, 8], strides = [1, 1, 1]} : vector<2x16x32xf32> to vector<2x16x8xf32>
    "tpu.trace_start"() <{level = 10 : i32, message = "bnd,bmd->bnm"}> : () -> ()
    %cst_13 = arith.constant dense<0.000000e+00> : vector<2x16x16xf32>
    %34 = tpu.matmul %31, %32, %cst_13 {dimension_numbers = #tpu.dot_dimension_numbers<[2], [2], [1], [1], [0, 0, 0, 1, 1, 1], [0], [0]>} : vector<2x16x8xf32>, vector<2x16x8xf32>, vector<2x16x16xf32> -> vector<2x16x16xf32>
    "tpu.trace_stop"() : () -> ()
    %cst_14 = arith.constant 0.353553385 : f32
    %35 = vector.broadcast %cst_14 : f32 to vector<2x16x16xf32>
    %36 = arith.mulf %34, %35 : vector<2x16x16xf32>
    %c1 = arith.constant 1 : index
    %c0_15 = arith.constant 0 : index
    %c0_16 = arith.constant 0 : index
    %37 = vector.load %arg2[%c1, %c0_15, %c0_16] : memref<4x16x16xf32, #tpu.memory_space<vmem>>, vector<1x16x16xf32>
    %38 = vector.shape_cast %37 : vector<1x16x16xf32> to vector<16x16xf32>
    %39 = vector.shape_cast %38 : vector<16x16xf32> to vector<1x16x16xf32>
    %40 = vector.broadcast %39 : vector<1x16x16xf32> to vector<2x16x16xf32>
    %41 = arith.addf %36, %40 : vector<2x16x16xf32>
    %42 = vector.shape_cast %3 : vector<16x16xf32> to vector<1x16x16xf32>
    %43 = vector.broadcast %42 : vector<1x16x16xf32> to vector<2x16x16xf32>
    %44 = arith.addf %41, %43 : vector<2x16x16xf32>
    %cst_17 = arith.constant dense<0xFF800000> : vector<2x16xf32>
    %45 = vector.multi_reduction <maximumf>, %44, %cst_17 [2] : vector<2x16x16xf32> to vector<2x16xf32>
    %46 = vector.shape_cast %45 : vector<2x16xf32> to vector<2x16x1xf32>
    %47 = vector.broadcast %46 : vector<2x16x1xf32> to vector<2x16x16xf32>
    %48 = arith.subf %44, %47 : vector<2x16x16xf32>
    %49 = math.exp %48 : vector<2x16x16xf32>
    %cst_18 = arith.constant dense<0.000000e+00> : vector<2x16xf32>
    %50 = vector.multi_reduction <add>, %49, %cst_18 [2] : vector<2x16x16xf32> to vector<2x16xf32>
    %51 = vector.shape_cast %50 : vector<2x16xf32> to vector<2x16x1xf32>
    %52 = vector.broadcast %51 : vector<2x16x1xf32> to vector<2x16x16xf32>
    %53 = arith.divf %49, %52 : vector<2x16x16xf32>
    "tpu.trace_start"() <{level = 10 : i32, message = "bnm,bmd->bnd"}> : () -> ()
    %cst_19 = arith.constant dense<0.000000e+00> : vector<2x16x8xf32>
    %54 = tpu.matmul %53, %33, %cst_19 {dimension_numbers = #tpu.dot_dimension_numbers<[2], [1], [1], [2], [0, 0, 0, 1, 1, 2], [0], [0]>} : vector<2x16x16xf32>, vector<2x16x8xf32>, vector<2x16x8xf32> -> vector<2x16x8xf32>
    "tpu.trace_stop"() : () -> ()
    %55 = vector.extract_strided_slice %4 {offsets = [0, 0, 16], sizes = [2, 16, 8], strides = [1, 1, 1]} : vector<2x16x32xf32> to vector<2x16x8xf32>
    %56 = vector.extract_strided_slice %5 {offsets = [0, 0, 16], sizes = [2, 16, 8], strides = [1, 1, 1]} : vector<2x16x32xf32> to vector<2x16x8xf32>
    %57 = vector.extract_strided_slice %6 {offsets = [0, 0, 16], sizes = [2, 16, 8], strides = [1, 1, 1]} : vector<2x16x32xf32> to vector<2x16x8xf32>
    "tpu.trace_start"() <{level = 10 : i32, message = "bnd,bmd->bnm"}> : () -> ()
    %cst_20 = arith.constant dense<0.000000e+00> : vector<2x16x16xf32>
    %58 = tpu.matmul %55, %56, %cst_20 {dimension_numbers = #tpu.dot_dimension_numbers<[2], [2], [1], [1], [0, 0, 0, 1, 1, 1], [0], [0]>} : vector<2x16x8xf32>, vector<2x16x8xf32>, vector<2x16x16xf32> -> vector<2x16x16xf32>
    "tpu.trace_stop"() : () -> ()
    %cst_21 = arith.constant 0.353553385 : f32
    %59 = vector.broadcast %cst_21 : f32 to vector<2x16x16xf32>
    %60 = arith.mulf %58, %59 : vector<2x16x16xf32>
    %c2 = arith.constant 2 : index
    %c0_22 = arith.constant 0 : index
    %c0_23 = arith.constant 0 : index
    %61 = vector.load %arg2[%c2, %c0_22, %c0_23] : memref<4x16x16xf32, #tpu.memory_space<vmem>>, vector<1x16x16xf32>
    %62 = vector.shape_cast %61 : vector<1x16x16xf32> to vector<16x16xf32>
    %63 = vector.shape_cast %62 : vector<16x16xf32> to vector<1x16x16xf32>
    %64 = vector.broadcast %63 : vector<1x16x16xf32> to vector<2x16x16xf32>
    %65 = arith.addf %60, %64 : vector<2x16x16xf32>
    %66 = vector.shape_cast %3 : vector<16x16xf32> to vector<1x16x16xf32>
    %67 = vector.broadcast %66 : vector<1x16x16xf32> to vector<2x16x16xf32>
    %68 = arith.addf %65, %67 : vector<2x16x16xf32>
    %cst_24 = arith.constant dense<0xFF800000> : vector<2x16xf32>
    %69 = vector.multi_reduction <maximumf>, %68, %cst_24 [2] : vector<2x16x16xf32> to vector<2x16xf32>
    %70 = vector.shape_cast %69 : vector<2x16xf32> to vector<2x16x1xf32>
    %71 = vector.broadcast %70 : vector<2x16x1xf32> to vector<2x16x16xf32>
    %72 = arith.subf %68, %71 : vector<2x16x16xf32>
    %73 = math.exp %72 : vector<2x16x16xf32>
    %cst_25 = arith.constant dense<0.000000e+00> : vector<2x16xf32>
    %74 = vector.multi_reduction <add>, %73, %cst_25 [2] : vector<2x16x16xf32> to vector<2x16xf32>
    %75 = vector.shape_cast %74 : vector<2x16xf32> to vector<2x16x1xf32>
    %76 = vector.broadcast %75 : vector<2x16x1xf32> to vector<2x16x16xf32>
    %77 = arith.divf %73, %76 : vector<2x16x16xf32>
    "tpu.trace_start"() <{level = 10 : i32, message = "bnm,bmd->bnd"}> : () -> ()
    %cst_26 = arith.constant dense<0.000000e+00> : vector<2x16x8xf32>
    %78 = tpu.matmul %77, %57, %cst_26 {dimension_numbers = #tpu.dot_dimension_numbers<[2], [1], [1], [2], [0, 0, 0, 1, 1, 2], [0], [0]>} : vector<2x16x16xf32>, vector<2x16x8xf32>, vector<2x16x8xf32> -> vector<2x16x8xf32>
    "tpu.trace_stop"() : () -> ()
    %79 = vector.extract_strided_slice %4 {offsets = [0, 0, 24], sizes = [2, 16, 8], strides = [1, 1, 1]} : vector<2x16x32xf32> to vector<2x16x8xf32>
    %80 = vector.extract_strided_slice %5 {offsets = [0, 0, 24], sizes = [2, 16, 8], strides = [1, 1, 1]} : vector<2x16x32xf32> to vector<2x16x8xf32>
    %81 = vector.extract_strided_slice %6 {offsets = [0, 0, 24], sizes = [2, 16, 8], strides = [1, 1, 1]} : vector<2x16x32xf32> to vector<2x16x8xf32>
    "tpu.trace_start"() <{level = 10 : i32, message = "bnd,bmd->bnm"}> : () -> ()
    %cst_27 = arith.constant dense<0.000000e+00> : vector<2x16x16xf32>
    %82 = tpu.matmul %79, %80, %cst_27 {dimension_numbers = #tpu.dot_dimension_numbers<[2], [2], [1], [1], [0, 0, 0, 1, 1, 1], [0], [0]>} : vector<2x16x8xf32>, vector<2x16x8xf32>, vector<2x16x16xf32> -> vector<2x16x16xf32>
    "tpu.trace_stop"() : () -> ()
    %cst_28 = arith.constant 0.353553385 : f32
    %83 = vector.broadcast %cst_28 : f32 to vector<2x16x16xf32>
    %84 = arith.mulf %82, %83 : vector<2x16x16xf32>
    %c3 = arith.constant 3 : index
    %c0_29 = arith.constant 0 : index
    %c0_30 = arith.constant 0 : index
    %85 = vector.load %arg2[%c3, %c0_29, %c0_30] : memref<4x16x16xf32, #tpu.memory_space<vmem>>, vector<1x16x16xf32>
    %86 = vector.shape_cast %85 : vector<1x16x16xf32> to vector<16x16xf32>
    %87 = vector.shape_cast %86 : vector<16x16xf32> to vector<1x16x16xf32>
    %88 = vector.broadcast %87 : vector<1x16x16xf32> to vector<2x16x16xf32>
    %89 = arith.addf %84, %88 : vector<2x16x16xf32>
    %90 = vector.shape_cast %3 : vector<16x16xf32> to vector<1x16x16xf32>
    %91 = vector.broadcast %90 : vector<1x16x16xf32> to vector<2x16x16xf32>
    %92 = arith.addf %89, %91 : vector<2x16x16xf32>
    %cst_31 = arith.constant dense<0xFF800000> : vector<2x16xf32>
    %93 = vector.multi_reduction <maximumf>, %92, %cst_31 [2] : vector<2x16x16xf32> to vector<2x16xf32>
    %94 = vector.shape_cast %93 : vector<2x16xf32> to vector<2x16x1xf32>
    %95 = vector.broadcast %94 : vector<2x16x1xf32> to vector<2x16x16xf32>
    %96 = arith.subf %92, %95 : vector<2x16x16xf32>
    %97 = math.exp %96 : vector<2x16x16xf32>
    %cst_32 = arith.constant dense<0.000000e+00> : vector<2x16xf32>
    %98 = vector.multi_reduction <add>, %97, %cst_32 [2] : vector<2x16x16xf32> to vector<2x16xf32>
    %99 = vector.shape_cast %98 : vector<2x16xf32> to vector<2x16x1xf32>
    %100 = vector.broadcast %99 : vector<2x16x1xf32> to vector<2x16x16xf32>
    %101 = arith.divf %97, %100 : vector<2x16x16xf32>
    "tpu.trace_start"() <{level = 10 : i32, message = "bnm,bmd->bnd"}> : () -> ()
    %cst_33 = arith.constant dense<0.000000e+00> : vector<2x16x8xf32>
    %102 = tpu.matmul %101, %81, %cst_33 {dimension_numbers = #tpu.dot_dimension_numbers<[2], [1], [1], [2], [0, 0, 0, 1, 1, 2], [0], [0]>} : vector<2x16x16xf32>, vector<2x16x8xf32>, vector<2x16x8xf32> -> vector<2x16x8xf32>
    "tpu.trace_stop"() : () -> ()
    %103 = tpu.concatenate %30, %54, %78, %102 in 2 : vector<2x16x8xf32>, vector<2x16x8xf32>, vector<2x16x8xf32>, vector<2x16x8xf32> -> vector<2x16x32xf32>
    %104 = vector.shape_cast %103 : vector<2x16x32xf32> to vector<32x32xf32>
    %c0_34 = arith.constant 0 : index
    %c0_35 = arith.constant 0 : index
    %105 = vector.load %arg4[%c0_34, %c0_35] : memref<32x32xf32, #tpu.memory_space<vmem>>, vector<32x32xf32>
    %cst_36 = arith.constant dense<0.000000e+00> : vector<32x32xf32>
    %106 = tpu.matmul %104, %105, %cst_36 {dimension_numbers = #tpu.dot_dimension_numbers<[1], [0], [0], [1], [0, 0, 1, 1], [], []>} : vector<32x32xf32>, vector<32x32xf32>, vector<32x32xf32> -> vector<32x32xf32>
    %c0_37 = arith.constant 0 : index
    %c0_38 = arith.constant 0 : index
    %107 = vector.load %arg5[%c0_37, %c0_38] : memref<1x32xf32, #tpu.memory_space<vmem>>, vector<1x32xf32>
    %108 = vector.broadcast %107 : vector<1x32xf32> to vector<32x32xf32>
    %109 = arith.addf %106, %108 : vector<32x32xf32>
    %110 = vector.shape_cast %109 : vector<32x32xf32> to vector<2x16x32xf32>
    %c0_39 = arith.constant 0 : index
    %c0_40 = arith.constant 0 : index
    %c0_41 = arith.constant 0 : index
    %c0_42 = arith.constant 0 : index
    %111 = vector.load %arg6[%c0_39, %c0_40, %c0_41, %c0_42] : memref<1x2x16x32xf32, #tpu.memory_space<vmem>>, vector<1x2x16x32xf32>
    %112 = vector.shape_cast %111 : vector<1x2x16x32xf32> to vector<2x16x32xf32>
    %113 = vector.shape_cast %110 : vector<2x16x32xf32> to vector<1x2x16x32xf32>
    tpu.vector_store %arg6[%c0_39, %c0_40, %c0_41, %c0_42], %113 {strides = array<i32>} : memref<1x2x16x32xf32, #tpu.memory_space<vmem>>, vector<1x2x16x32xf32>,
    return
  }
  func.func @transform_0(%arg0: i32) -> (i32, i32, i32, i32) {
    %c0_i32 = arith.constant 0 : i32
    %c0_i32_0 = arith.constant 0 : i32
    %c0_i32_1 = arith.constant 0 : i32
    %c0_i32_2 = arith.constant 0 : i32
    return %arg0, %c0_i32, %c0_i32_0, %c0_i32_1 : i32, i32, i32, i32
  }
  func.func @transform_1(%arg0: i32) -> (i32, i32, i32) {
    %c0_i32 = arith.constant 0 : i32
    %c0_i32_0 = arith.constant 0 : i32
    %c0_i32_1 = arith.constant 0 : i32
    %c0_i32_2 = arith.constant 0 : i32
    return %c0_i32, %c0_i32_0, %c0_i32_1 : i32, i32, i32
  }
  func.func @transform_2(%arg0: i32) -> (i32, i32, i32) {
    %c0_i32 = arith.constant 0 : i32
    %c0_i32_0 = arith.constant 0 : i32
    %c0_i32_1 = arith.constant 0 : i32
    return %arg0, %c0_i32, %c0_i32_0 : i32, i32, i32
  }
  func.func @transform_3(%arg0: i32) -> (i32, i32) {
    %c0_i32 = arith.constant 0 : i32
    %c0_i32_0 = arith.constant 0 : i32
    %c0_i32_1 = arith.constant 0 : i32
    return %c0_i32, %c0_i32_0 : i32, i32
  }
  func.func @transform_4(%arg0: i32) -> (i32, i32) {
    %c0_i32 = arith.constant 0 : i32
    %c0_i32_0 = arith.constant 0 : i32
    %c0_i32_1 = arith.constant 0 : i32
    return %c0_i32, %c0_i32_0 : i32, i32
  }
  func.func @transform_5(%arg0: i32) -> (i32, i32, i32, i32) {
    %c0_i32 = arith.constant 0 : i32
    %c0_i32_0 = arith.constant 0 : i32
    %c0_i32_1 = arith.constant 0 : i32
    %c0_i32_2 = arith.constant 0 : i32
    return %arg0, %c0_i32, %c0_i32_0, %c0_i32_1 : i32, i32, i32, i32
  }
}

module attributes {stable_mosaic.version = 11 : i64} {
  func.func @_ffn_kernel(%arg0: i32, %arg1: memref<32x32xf32, #tpu.memory_space<vmem>>, %arg2: memref<32x32xf32, #tpu.memory_space<vmem>>, %arg3: memref<32x64xf32, #tpu.memory_space<vmem>>, %arg4: memref<1x64xf32, #tpu.memory_space<vmem>>, %arg5: memref<64x32xf32, #tpu.memory_space<vmem>>, %arg6: memref<1x32xf32, #tpu.memory_space<vmem>>, %arg7: memref<1x32xf32, #tpu.memory_space<vmem>>, %arg8: memref<1x32xf32, #tpu.memory_space<vmem>>, %arg9: memref<32x32xf32, #tpu.memory_space<vmem>>) attributes {dimension_semantics = [#tpu.dimension_semantics<parallel>], iteration_bounds = array<i64: 4>, scalar_prefetch = 0 : i64, scratch_operands = 0 : i64, tpu.core_type = #tpu.core_type<tc>, window_params = [{transform_indices = @transform_0, window_bounds = array<i64: 32, 32>}, {transform_indices = @transform_1, window_bounds = array<i64: 32, 32>}, {pipeline_mode = #tpu.pipeline_mode<synchronous>, transform_indices = @transform_2, window_bounds = array<i64: 32, 64>}, {pipeline_mode = #tpu.pipeline_mode<synchronous>, transform_indices = @transform_3, window_bounds = array<i64: 1, 64>}, {pipeline_mode = #tpu.pipeline_mode<synchronous>, transform_indices = @transform_4, window_bounds = array<i64: 64, 32>}, {pipeline_mode = #tpu.pipeline_mode<synchronous>, transform_indices = @transform_5, window_bounds = array<i64: 1, 32>}, {pipeline_mode = #tpu.pipeline_mode<synchronous>, transform_indices = @transform_6, window_bounds = array<i64: 1, 32>}, {pipeline_mode = #tpu.pipeline_mode<synchronous>, transform_indices = @transform_7, window_bounds = array<i64: 1, 32>}, {transform_indices = @transform_8, window_bounds = array<i64: 32, 32>}]} {
    %c0 = arith.constant 0 : index
    %c0_0 = arith.constant 0 : index
    %0 = vector.load %arg1[%c0, %c0_0] : memref<32x32xf32, #tpu.memory_space<vmem>>, vector<32x32xf32>
    %c0_1 = arith.constant 0 : index
    %c0_2 = arith.constant 0 : index
    %1 = vector.load %arg2[%c0_1, %c0_2] : memref<32x32xf32, #tpu.memory_space<vmem>>, vector<32x32xf32>
    %2 = arith.addf %0, %1 : vector<32x32xf32>
    %cst = arith.constant dense<0.000000e+00> : vector<32xf32>
    %3 = vector.multi_reduction <add>, %2, %cst [1] : vector<32x32xf32> to vector<32xf32>
    %4 = vector.shape_cast %3 : vector<32xf32> to vector<32x1xf32>
    %cst_3 = arith.constant 3.200000e+01 : f32
    %5 = vector.broadcast %cst_3 : f32 to vector<32x1xf32>
    %6 = arith.divf %4, %5 : vector<32x1xf32>
    %7 = vector.broadcast %6 : vector<32x1xf32> to vector<32x32xf32>
    %8 = arith.subf %2, %7 : vector<32x32xf32>
    %9 = arith.mulf %8, %8 : vector<32x32xf32>
    %cst_4 = arith.constant dense<0.000000e+00> : vector<32xf32>
    %10 = vector.multi_reduction <add>, %9, %cst_4 [1] : vector<32x32xf32> to vector<32xf32>
    %11 = vector.shape_cast %10 : vector<32xf32> to vector<32x1xf32>
    %cst_5 = arith.constant 3.200000e+01 : f32
    %12 = vector.broadcast %cst_5 : f32 to vector<32x1xf32>
    %13 = arith.divf %11, %12 : vector<32x1xf32>
    %cst_6 = arith.constant 9.99999974E-6 : f32
    %14 = vector.broadcast %cst_6 : f32 to vector<32x1xf32>
    %15 = arith.addf %13, %14 : vector<32x1xf32>
    %16 = math.rsqrt %15 : vector<32x1xf32>
    %17 = vector.broadcast %16 : vector<32x1xf32> to vector<32x32xf32>
    %18 = arith.mulf %8, %17 : vector<32x32xf32>
    %c0_7 = arith.constant 0 : index
    %c0_8 = arith.constant 0 : index
    %19 = vector.load %arg7[%c0_7, %c0_8] : memref<1x32xf32, #tpu.memory_space<vmem>>, vector<1x32xf32>
    %20 = vector.broadcast %19 : vector<1x32xf32> to vector<32x32xf32>
    %21 = arith.mulf %18, %20 : vector<32x32xf32>
    %c0_9 = arith.constant 0 : index
    %c0_10 = arith.constant 0 : index
    %22 = vector.load %arg8[%c0_9, %c0_10] : memref<1x32xf32, #tpu.memory_space<vmem>>, vector<1x32xf32>
    %23 = vector.broadcast %22 : vector<1x32xf32> to vector<32x32xf32>
    %24 = arith.addf %21, %23 : vector<32x32xf32>
    %c0_11 = arith.constant 0 : index
    %c0_12 = arith.constant 0 : index
    %25 = vector.load %arg3[%c0_11, %c0_12] : memref<32x64xf32, #tpu.memory_space<vmem>>, vector<32x64xf32>
    %cst_13 = arith.constant dense<0.000000e+00> : vector<32x64xf32>
    %26 = tpu.matmul %24, %25, %cst_13 {dimension_numbers = #tpu.dot_dimension_numbers<[1], [0], [0], [1], [0, 0, 1, 1], [], []>} : vector<32x32xf32>, vector<32x64xf32>, vector<32x64xf32> -> vector<32x64xf32>
    %c0_14 = arith.constant 0 : index
    %c0_15 = arith.constant 0 : index
    %27 = vector.load %arg4[%c0_14, %c0_15] : memref<1x64xf32, #tpu.memory_space<vmem>>, vector<1x64xf32>
    %28 = vector.broadcast %27 : vector<1x64xf32> to vector<32x64xf32>
    %29 = arith.addf %26, %28 : vector<32x64xf32>
    %cst_16 = arith.constant 5.000000e-01 : f32
    %30 = vector.broadcast %cst_16 : f32 to vector<32x64xf32>
    %31 = arith.mulf %30, %29 : vector<32x64xf32>
    %cst_17 = arith.constant 0.707106769 : f32
    %32 = vector.broadcast %cst_17 : f32 to vector<32x64xf32>
    %33 = arith.mulf %29, %32 : vector<32x64xf32>
    %34 = math.absf %33 : vector<32x64xf32>
    %cst_18 = arith.constant 0.327591091 : f32
    %35 = vector.broadcast %cst_18 : f32 to vector<32x64xf32>
    %36 = arith.mulf %35, %34 : vector<32x64xf32>
    %cst_19 = arith.constant 1.000000e+00 : f32
    %37 = vector.broadcast %cst_19 : f32 to vector<32x64xf32>
    %38 = arith.addf %37, %36 : vector<32x64xf32>
    %cst_20 = arith.constant 1.000000e+00 : f32
    %39 = vector.broadcast %cst_20 : f32 to vector<32x64xf32>
    %40 = arith.divf %39, %38 : vector<32x64xf32>
    %cst_21 = arith.constant 1.06140542 : f32
    %41 = vector.broadcast %cst_21 : f32 to vector<32x64xf32>
    %42 = arith.mulf %41, %40 : vector<32x64xf32>
    %cst_22 = arith.constant -1.45315206 : f32
    %43 = vector.broadcast %cst_22 : f32 to vector<32x64xf32>
    %44 = arith.addf %42, %43 : vector<32x64xf32>
    %45 = arith.mulf %44, %40 : vector<32x64xf32>
    %cst_23 = arith.constant 1.42141378 : f32
    %46 = vector.broadcast %cst_23 : f32 to vector<32x64xf32>
    %47 = arith.addf %45, %46 : vector<32x64xf32>
    %48 = arith.mulf %47, %40 : vector<32x64xf32>
    %cst_24 = arith.constant -0.284496725 : f32
    %49 = vector.broadcast %cst_24 : f32 to vector<32x64xf32>
    %50 = arith.addf %48, %49 : vector<32x64xf32>
    %51 = arith.mulf %50, %40 : vector<32x64xf32>
    %cst_25 = arith.constant 0.254829586 : f32
    %52 = vector.broadcast %cst_25 : f32 to vector<32x64xf32>
    %53 = arith.addf %51, %52 : vector<32x64xf32>
    %54 = arith.mulf %53, %40 : vector<32x64xf32>
    %cst_26 = arith.constant 0.000000e+00 : f32
    %55 = vector.broadcast %cst_26 : f32 to vector<32x64xf32>
    %56 = arith.subf %55, %34 : vector<32x64xf32>
    %57 = arith.mulf %56, %34 : vector<32x64xf32>
    %58 = math.exp %57 : vector<32x64xf32>
    %59 = arith.mulf %54, %58 : vector<32x64xf32>
    %cst_27 = arith.constant 1.000000e+00 : f32
    %60 = vector.broadcast %cst_27 : f32 to vector<32x64xf32>
    %61 = arith.subf %60, %59 : vector<32x64xf32>
    %cst_28 = arith.constant 0.000000e+00 : f32
    %62 = vector.broadcast %cst_28 : f32 to vector<32x64xf32>
    %63 = arith.cmpf oge, %33, %62 : vector<32x64xf32>
    %cst_29 = arith.constant 0.000000e+00 : f32
    %64 = vector.broadcast %cst_29 : f32 to vector<32x64xf32>
    %65 = arith.subf %64, %61 : vector<32x64xf32>
    %66 = arith.select %63, %61, %65 : vector<32x64xi1>, vector<32x64xf32>
    %cst_30 = arith.constant 1.000000e+00 : f32
    %67 = vector.broadcast %cst_30 : f32 to vector<32x64xf32>
    %68 = arith.addf %67, %66 : vector<32x64xf32>
    %69 = arith.mulf %31, %68 : vector<32x64xf32>
    %c0_31 = arith.constant 0 : index
    %c0_32 = arith.constant 0 : index
    %70 = vector.load %arg5[%c0_31, %c0_32] : memref<64x32xf32, #tpu.memory_space<vmem>>, vector<64x32xf32>
    %cst_33 = arith.constant dense<0.000000e+00> : vector<32x32xf32>
    %71 = tpu.matmul %69, %70, %cst_33 {dimension_numbers = #tpu.dot_dimension_numbers<[1], [0], [0], [1], [0, 0, 1, 1], [], []>} : vector<32x64xf32>, vector<64x32xf32>, vector<32x32xf32> -> vector<32x32xf32>
    %c0_34 = arith.constant 0 : index
    %c0_35 = arith.constant 0 : index
    %72 = vector.load %arg6[%c0_34, %c0_35] : memref<1x32xf32, #tpu.memory_space<vmem>>, vector<1x32xf32>
    %73 = vector.broadcast %72 : vector<1x32xf32> to vector<32x32xf32>
    %74 = arith.addf %71, %73 : vector<32x32xf32>
    %75 = arith.addf %74, %2 : vector<32x32xf32>
    %c0_36 = arith.constant 0 : index
    %c0_37 = arith.constant 0 : index
    %76 = vector.load %arg9[%c0_36, %c0_37] : memref<32x32xf32, #tpu.memory_space<vmem>>, vector<32x32xf32>
    tpu.vector_store %arg9[%c0_36, %c0_37], %75 {strides = array<i32>} : memref<32x32xf32, #tpu.memory_space<vmem>>, vector<32x32xf32>,
    return
  }
  func.func @transform_0(%arg0: i32) -> (i32, i32) {
    %c0_i32 = arith.constant 0 : i32
    %c0_i32_0 = arith.constant 0 : i32
    return %arg0, %c0_i32 : i32, i32
  }
  func.func @transform_1(%arg0: i32) -> (i32, i32) {
    %c0_i32 = arith.constant 0 : i32
    %c0_i32_0 = arith.constant 0 : i32
    return %arg0, %c0_i32 : i32, i32
  }
  func.func @transform_2(%arg0: i32) -> (i32, i32) {
    %c0_i32 = arith.constant 0 : i32
    %c0_i32_0 = arith.constant 0 : i32
    %c0_i32_1 = arith.constant 0 : i32
    return %c0_i32, %c0_i32_0 : i32, i32
  }
  func.func @transform_3(%arg0: i32) -> (i32, i32) {
    %c0_i32 = arith.constant 0 : i32
    %c0_i32_0 = arith.constant 0 : i32
    %c0_i32_1 = arith.constant 0 : i32
    return %c0_i32, %c0_i32_0 : i32, i32
  }
  func.func @transform_4(%arg0: i32) -> (i32, i32) {
    %c0_i32 = arith.constant 0 : i32
    %c0_i32_0 = arith.constant 0 : i32
    %c0_i32_1 = arith.constant 0 : i32
    return %c0_i32, %c0_i32_0 : i32, i32
  }
  func.func @transform_5(%arg0: i32) -> (i32, i32) {
    %c0_i32 = arith.constant 0 : i32
    %c0_i32_0 = arith.constant 0 : i32
    %c0_i32_1 = arith.constant 0 : i32
    return %c0_i32, %c0_i32_0 : i32, i32
  }
  func.func @transform_6(%arg0: i32) -> (i32, i32) {
    %c0_i32 = arith.constant 0 : i32
    %c0_i32_0 = arith.constant 0 : i32
    %c0_i32_1 = arith.constant 0 : i32
    return %c0_i32, %c0_i32_0 : i32, i32
  }
  func.func @transform_7(%arg0: i32) -> (i32, i32) {
    %c0_i32 = arith.constant 0 : i32
    %c0_i32_0 = arith.constant 0 : i32
    %c0_i32_1 = arith.constant 0 : i32
    return %c0_i32, %c0_i32_0 : i32, i32
  }
  func.func @transform_8(%arg0: i32) -> (i32, i32) {
    %c0_i32 = arith.constant 0 : i32
    %c0_i32_0 = arith.constant 0 : i32
    return %arg0, %c0_i32 : i32, i32
  }
}

</mosaic_0001>

<bundles_post_ra>
// kernel: swin_block_forward.3
= control target key start
LH: loop header
LB: loop body
LE: loop exit
PB: predicated region body
PF: predicated region fallthrough
CT: control target
= control target key end

     0   :  { %s542_s18 = smov 0   ;;  %s619_s0 = inlined_call_operand.vmem [shape: f32[128,32], index: 0, kind: input, shape index: {}]   ;;  %s620_s1 = inlined_call_operand.vmem [shape: f32[32,96], index: 1, kind: input, shape index: {}]   ;;  %s621_s2 = inlined_call_operand.vmem [shape: f32[1,96], index: 2, kind: input, shape index: {}]   ;;  %s622_s3 = inlined_call_operand.vmem [shape: f32[1,32], index: 3, kind: input, shape index: {}]   ;;  %s623_s4 = inlined_call_operand.vmem [shape: f32[1,32], index: 4, kind: input, shape index: {}]   ;;  %s624_s5 = inlined_call_operand.vmem [shape: f32[128,96], index: 5, kind: output, shape index: {}]  }
   0x1 LB: > { %s454_s19 = sadd.s32 4294967295, %s509_s18   ;;  %p458_p0 = scmp.ge.s32.totalorder %s509_s18, 1  ;;  %s509_s18 = sphi %s542_s18, %s15_s18  }
   0x2   : > { %p188_p1 = scmp.lt.s32.totalorder %s509_s18, 5 }
   0x4   : > { %p189_p2 = pnand %p458_p0, %p188_p1 }
   0x5   : > { %s459_s20 = sshll.u32 (!%p189_p2), %s454_s19, 2 }
   0x6   : > { %192 = sbr.rel (%p189_p2) target bundleno = 426 (0x1aa), region = 40  ;;  %p217_p3 = scmp.lt.s32.totalorder (!%p189_p2), %s459_s20, 15 }
   0xb   : > { %s626_s20 = smov (!%p217_p3, %s459_s20), 15  ;;  %vm232_vm0 = vcmask 261120   ;;  %v511_v8 = vmov 32.0   ;;  %v347_v35 = vld [vmem:[%s620_s1 + $0x18] sm:$0xff]  ;;  %v346_v36 = vld [vmem:[%s620_s1 + $0x10] sm:$0xff]  ;;  %v345_v37 = vld [vmem:[%s620_s1 + $0x8] sm:$0xff] }
   0xc   : > { %s460_s21 = sshll.u32 %s626_s20, 3  ;;  %493 = vrcp.f32 %v511_v8  ;;  %376 = vmatpush.msra.mxu0 %v347_v35  ;;  %470 = vmatpush.msra.mxu2 %v347_v35  ;;  %v344_v38 = vld [vmem:[%s620_s1] sm:$0xff]  ;;  %vm393_vm14 = vcmask 785408  }
   0xd   : > { %s220_s24 = scalar_lea.vmem %s619_s0, %s460_s21  ;;  %469 = vmatpush.msra.mxu1 %v347_v35  ;;  %471 = vmatpush.msra.mxu3 %v347_v35  ;;  %v491_v8 = vld [vmem:[%s623_s4] ss:$0 sm:$0xff]  ;;  %s226_s16 = scalar_lea.vmem %s624_s5, %s460_s21 }
   0xe   : > { %v230_v0 = vld [vmem:[%s220_s24 + $0x10] sm:$0xff]  ;;  %v228_v1 = vld [vmem:[%s220_s24] sm:$0xff]  ;;  %v231_v4 = vld [vmem:[%s220_s24 + $0x18] sm:$0xff]  ;;  %377 = vmatpush.msra.mxu0 %v346_v36  ;;  %473 = vmatpush.msra.mxu2 %v346_v36 }
   0xf   : > { %v239_v2 = vsel %vm232_vm0, %v230_v0, 0.0  ;;  %v233_v3 = vsel %vm232_vm0, %v228_v1, 0.0  ;;  %v229_v5 = vld [vmem:[%s220_s24 + $0x8] sm:$0xff]  ;;  %v242_v6 = vsel %vm232_vm0, %v231_v4, 0.0  ;;  %472 = vmatpush.msra.mxu1 %v346_v36  ;;  %474 = vmatpush.msra.mxu3 %v346_v36 }
  0x10   : > { %240 = vadd.xlane.f32.xlu0 %v239_v2  ;;  %234 = vadd.xlane.f32.xlu1 %v233_v3  ;;  %v236_v7 = vsel %vm232_vm0, %v229_v5, 0.0  ;;  %v490_v3 = vld [vmem:[%s622_s3] ss:$0 sm:$0xff] }
  0x11   : > { %378 = vmatpush.msra.mxu0 %v345_v37  ;;  %476 = vmatpush.msra.mxu2 %v345_v37 }
  0x12   : > { %v494_v9 = vpop.eup %493  ;;  %475 = vmatpush.msra.mxu1 %v345_v37  ;;  %477 = vmatpush.msra.mxu3 %v345_v37 }
  0x13   : > { %v246_v10 = vmul.f32 32.0, %v494_v9  ;;  %vm250_vm1 = vweird.f32 %v494_v9  ;;  %379 = vmatpush.msra.mxu0 %v344_v38  ;;  %479 = vmatpush.msra.mxu2 %v344_v38 }
  0x14   : > { %478 = vmatpush.msra.mxu1 %v344_v38  ;;  %480 = vmatpush.msra.mxu3 %v344_v38 }
  0x15   : > { %v247_v11 = vsub.f32 1.0, %v246_v10 }
  0x17   : > { %v248_v12 = vmul.f32 %v494_v9, %v247_v11 }
  0x18   : > { %243 = vadd.xlane.f32.xlu0 %v242_v6  ;;  %237 = vadd.xlane.f32.xlu1 %v236_v7 }
  0x19   : > { %v249_v13 = vadd.f32 %v494_v9, %v248_v12 }
  0x1b   : > { %v251_v14 = vsel %vm250_vm1, %v494_v9, %v249_v13 }
  0x83   : > { %v241_v15 = vpop.xlane.xlu0 %240  ;;  %v235_v16 = vpop.xlane.xlu1 %234 }
  0x84   : > { %v254_v17 = vmul.f32 %v251_v14, %v241_v15  ;;  %v252_v18 = vmul.f32 %v251_v14, %v235_v16 }
  0x86   : > { %v562_v19 = vsub.f32 %v230_v0, %v254_v17  ;;  %v564_v20 = vsub.f32 %v228_v1, %v252_v18 }
  0x88   : > { %v262_v21 = vmul.f32 %v562_v19, %v562_v19  ;;  %v260_v22 = vmul.f32 %v564_v20, %v564_v20 }
  0x8a   : > { %v270_v23 = vsel %vm232_vm0, %v262_v21, 0.0  ;;  %v264_v24 = vsel %vm232_vm0, %v260_v22, 0.0 }
  0x8b   : > { %271 = vadd.xlane.f32.xlu2 %v270_v23  ;;  %v244_v25 = vpop.xlane.xlu0 %243  ;;  %265 = vadd.xlane.f32.xlu0 %v264_v24  ;;  %v238_v26 = vpop.xlane.xlu1 %237 }
  0x8c   : > { %v255_v27 = vmul.f32 %v251_v14, %v244_v25  ;;  %v253_v28 = vmul.f32 %v251_v14, %v238_v26 }
  0x8e   : > { %v572_v29 = vsub.f32 %v231_v4, %v255_v27  ;;  %v574_v30 = vsub.f32 %v229_v5, %v253_v28 }
  0x90   : > { %v263_v31 = vmul.f32 %v572_v29, %v572_v29  ;;  %v261_v32 = vmul.f32 %v574_v30, %v574_v30 }
  0x92   : > { %v273_v33 = vsel %vm232_vm0, %v263_v31, 0.0  ;;  %v267_v34 = vsel %vm232_vm0, %v261_v32, 0.0  ;;  %v492_v31 = vld [vmem:[%s621_s2] ss:$0 sm:$0xff] }
  0x93   : > { %274 = vadd.xlane.f32.xlu2 %v273_v33  ;;  %268 = vadd.xlane.f32.xlu1 %v267_v34 }
  0xfe   : > { %v272_v39 = vpop.xlane.xlu2 %271  ;;  %v266_v40 = vpop.xlane.xlu0 %265 }
  0xff   : > { %v278_v41 = vmul.f32 %v272_v39, %v251_v14  ;;  %v276_v42 = vmul.f32 %v266_v40, %v251_v14 }
 0x101   : > { %v282_v43 = vadd.f32 1e-05, %v278_v41  ;;  %v280_v44 = vadd.f32 1e-05, %v276_v42 }
 0x103   : > { %495 = vrsqrt.f32 %v282_v43  ;;  %vm290_vm3 = vweird.f32 %v280_v44  ;;  %vm310_vm5 = vweird.f32 %v282_v43 }
 0x104   : > { %497 = vrsqrt.f32 %v280_v44 }
 0x106   : > { %v275_v45 = vpop.xlane.xlu2 %274  ;;  %v269_v46 = vpop.xlane.xlu1 %268 }
 0x107   : > { %v279_v47 = vmul.f32 %v275_v45, %v251_v14  ;;  %v277_v48 = vmul.f32 %v269_v46, %v251_v14 }
 0x109   : > { %v496_v49 = vpop.eup %495  ;;  %v283_v50 = vadd.f32 1e-05, %v279_v47  ;;  %v281_v51 = vadd.f32 1e-05, %v277_v48 }
 0x10a   : > { %v498_v52 = vpop.eup %497  ;;  %v305_v53 = vmul.f32 %v496_v49, %v282_v43  ;;  %vm311_vm2 = vweird.f32 %v496_v49 }
 0x10b   : > { %v285_v54 = vmul.f32 %v498_v52, %v280_v44  ;;  %499 = vrsqrt.f32 %v283_v50  ;;  %vm291_vm4 = vweird.f32 %v498_v52  ;;  %vm312_vm6 = vmor %vm310_vm5, %vm311_vm2  ;;  %vm300_vm9 = vweird.f32 %v281_v51 }
 0x10c   : > { %v306_v55 = vmul.f32 %v496_v49, %v305_v53  ;;  %501 = vrsqrt.f32 %v281_v51  ;;  %vm292_vm7 = vmor %vm290_vm3, %vm291_vm4  ;;  %vm320_vm11 = vweird.f32 %v283_v50 }
 0x10d   : > { %v286_v56 = vmul.f32 %v498_v52, %v285_v54 }
 0x10e   : > { %v307_v57 = vmul.f32 0.5, %v306_v55 }
 0x10f   : > { %v287_v58 = vmul.f32 0.5, %v286_v56 }
 0x110   : > { %v308_v59 = vsub.f32 1.5, %v307_v57 }
 0x111   : > { %v500_v60 = vpop.eup %499  ;;  %v288_v61 = vsub.f32 1.5, %v287_v58 }
 0x112   : > { %v502_v62 = vpop.eup %501  ;;  %v309_v63 = vmul.f32 %v496_v49, %v308_v59  ;;  %v315_v0 = vmul.f32 %v500_v60, %v283_v50  ;;  %vm321_vm8 = vweird.f32 %v500_v60 }
 0x113   : > { %v289_v1 = vmul.f32 %v498_v52, %v288_v61  ;;  %v295_v2 = vmul.f32 %v502_v62, %v281_v51  ;;  %vm301_vm10 = vweird.f32 %v502_v62  ;;  %vm322_vm12 = vmor %vm320_vm11, %vm321_vm8 }
 0x114   : > { %v313_v4 = vsel %vm312_vm6, %v496_v49, %v309_v63  ;;  %v316_v5 = vmul.f32 %v500_v60, %v315_v0  ;;  %vm302_vm13 = vmor %vm300_vm9, %vm301_vm10 }
 0x115   : > { %v293_v6 = vsel %vm292_vm7, %v498_v52, %v289_v1  ;;  %v296_v7 = vmul.f32 %v502_v62, %v295_v2  ;;  %v326_v9 = vmul.f32 %v313_v4, %v562_v19 }
 0x116   : > { %v317_v10 = vmul.f32 0.5, %v316_v5  ;;  %v324_v11 = vmul.f32 %v293_v6, %v564_v20 }
 0x117   : > { %v297_v12 = vmul.f32 0.5, %v296_v7  ;;  %v334_v13 = vmul.f32 %v490_v3, %v326_v9 }
 0x118   : > { %v318_v14 = vsub.f32 1.5, %v317_v10  ;;  %v332_v15 = vmul.f32 %v490_v3, %v324_v11 }
 0x119   : > { %v298_v16 = vsub.f32 1.5, %v297_v12  ;;  %v342_v17 = vadd.f32 %v491_v8, %v334_v13 }
 0x11a   : > { %v319_v18 = vmul.f32 %v500_v60, %v318_v14  ;;  %v340_v21 = vadd.f32 %v491_v8, %v332_v15 }
 0x11b   : > { %v299_v22 = vmul.f32 %v502_v62, %v298_v16  ;;  %465 = vmatmul.msk.f32.vlgmr.msra.gmra.mxu2 %vm232_vm0, %v342_v17 }
 0x11c   : > { %v323_v19 = vsel %vm322_vm12, %v500_v60, %v319_v18  ;;  %463 = vmatmul.msk.f32.vlgmr.msra.gmra.mxu0 %vm232_vm0, %v340_v21 }
 0x11d   : > { %v303_v20 = vsel %vm302_vm13, %v502_v62, %v299_v22  ;;  %v327_v23 = vmul.f32 %v323_v19, %v572_v29 }
 0x11e   : > { %v325_v24 = vmul.f32 %v303_v20, %v574_v30 }
 0x11f   : > { %v335_v25 = vmul.f32 %v490_v3, %v327_v23 }
 0x120   : > { %v333_v26 = vmul.f32 %v490_v3, %v325_v24 }
 0x121   : > { %v343_v27 = vadd.f32 %v491_v8, %v335_v25 }
 0x122   : > { %v341_v28 = vadd.f32 %v491_v8, %v333_v26 }
 0x123   : > { %466 = vmatmul.msk.f32.vlgmr.msra.gmra.mxu3 %vm232_vm0, %v343_v27 }
 0x124   : > { %464 = vmatmul.msk.f32.vlgmr.msra.gmra.mxu1 %vm232_vm0, %v341_v28 }
 0x199   : > { %v381_v29 = vpop.f32.mrf.mxu0 }
 0x19a   : > { %v382_v30 = vadd.f32 %v492_v31, %v381_v29 }
 0x19c   : > { %394 = vst.msk [vmem:[%s226_s16] sm:$0xff] %vm393_vm14, %v382_v30 }
 0x19e   : > { %v387_v32 = vpop.f32.mrf.mxu2 }
 0x19f   : > { %v388_v33 = vadd.f32 %v492_v31, %v387_v32 }
 0x1a1   : > { %396 = vst.msk [vmem:[%s226_s16 + $0x10] sm:$0xff] %vm393_vm14, %v388_v33  ;;  %v384_v34 = vpop.f32.mrf.mxu1 }
 0x1a2   : > { %v385_v35 = vadd.f32 %v492_v31, %v384_v34 }
 0x1a4   : > { %395 = vst.msk [vmem:[%s226_s16 + $0x8] sm:$0xff] %vm393_vm14, %v385_v35 }
 0x1a6   : > { %v390_v36 = vpop.f32.mrf.mxu3 }
 0x1a7   : > { %v391_v37 = vadd.f32 %v492_v31, %v390_v36 }
 0x1a9   : > { %397 = vst.msk [vmem:[%s226_s16 + $0x18] sm:$0xff] %vm393_vm14, %v391_v37 }
 0x1aa PF: > { %s15_s18 = sadd.s32 1, %s509_s18  }
 0x1ab   : > { %p12_p4 = scmp.ge.s32.totalorder %s15_s18, 6  }
 0x1ad   :  { %14 = sbr.rel (!%p12_p4) target bundleno = 1 (0x1), region = 70 }

// kernel: swin_block_forward.4
= control target key start
LH: loop header
LB: loop body
LE: loop exit
PB: predicated region body
PF: predicated region fallthrough
CT: control target
= control target key end

     0   :  { %s1723_s18 = smov 0   ;;  %s2188_s0 = inlined_call_operand.vmem [shape: f32[4,2,16,96], index: 0, kind: input, shape index: {}]   ;;  %s2189_s1 = inlined_call_operand.vmem [shape: f32[4,16,16], index: 1, kind: input, shape index: {}]   ;;  %s2190_s2 = inlined_call_operand.vmem [shape: f32[4,16,16], index: 2, kind: input, shape index: {}]   ;;  %s2191_s3 = inlined_call_operand.vmem [shape: f32[32,32], index: 3, kind: input, shape index: {}]   ;;  %s2192_s4 = inlined_call_operand.vmem [shape: f32[1,32], index: 4, kind: input, shape index: {}]   ;;  %s2193_s5 = inlined_call_operand.vmem [shape: f32[4,2,16,32], index: 5, kind: output, shape index: {}]  }
   0x1 LB: > { %s1466_s19 = sadd.s32 4294967295, %s1677_s18   ;;  %p1470_p0 = scmp.ge.s32.totalorder %s1677_s18, 1  ;;  %s1677_s18 = sphi %s1723_s18, %s15_s18  }
   0x2   : > { %p197_p1 = scmp.lt.s32.totalorder %s1677_s18, 5 }
   0x4   : > { %p198_p2 = pnand %p1470_p0, %p197_p1 }
   0x5   : > { %p230_p3 = scmp.lt.s32.totalorder (!%p198_p2), %s1466_s19, 3  ;;  %s1679_s24 = smov (!%p198_p2), 96  }
   0x6   : > { %201 = sbr.rel (%p198_p2) target bundleno = 1486 (0x5ce), region = 40  ;;  %s1680_s25 = smov (!%p198_p2), 64  }
   0x7   : > { %s1681_s7 = smov (!%p198_p2), 120   ;;  %s1682_s8 = smov (!%p198_p2), 112  }
   0x8   : > { %s1683_s9 = smov (!%p198_p2), 88   ;;  %s1684_s10 = smov (!%p198_p2), 80  }
   0x9   : > { %s1685_s11 = smov (!%p198_p2), 72   ;;  %s1686_s12 = smov (!%p198_p2), 104  }
   0xa   : > { %s1687_s15 = smov (!%p198_p2), 56  }
   0xb   : > { %s2199_s19 = smov (!%p230_p3, %s1466_s19), 3  ;;  %vm257_vm0 = vcmask 64512   ;;  %v331_v11 = vld [vmem:[%s2189_s1 + $0x8] sm:$0xff]  ;;  %vm340_vm1 = vcmask 130048   ;;  %v330_v41 = vld [vmem:[%s2189_s1] sm:$0xff] }
   0xc   : > { %s1537_s20 = sshll.u32 %s2199_s19, 5  ;;  %s1538_s26 = sshll.u32 %s2199_s19, 4 }
   0xd   : > { %s234_s23 = scalar_lea.vmem %s2188_s0, %s1537_s20  ;;  %s1778_s6 = scalar_lea.vmem %s2190_s2, %s1538_s26 }
   0xe   : > { %v1739_v0 = vld [vmem:[%s234_s23 + $0x18] sm:$0xff]  ;;  %v1741_v1 = vld [vmem:[%s234_s23 + $0x8] sm:$0xff]  ;;  %v1745_v2 = vld [vmem:[%s234_s23 + $0x10] sm:$0xff]  ;;  %s244_s26 = scalar_lea.vmem %s2193_s5, %s1537_s20 }
   0xf   : > { %293 = vrot.lane.b32.xlu0 %v1739_v0, %s1679_s24  ;;  %255 = vrot.lane.b32.xlu1 %v1741_v1, %s1679_s24  ;;  %v1747_v3 = vld [vmem:[%s234_s23] sm:$0xff]  ;;  %v1753_v4 = vpack.i.bf16 %v1745_v2, %v1739_v0  ;;  %v1781_v16 = vld [vmem:[%s1778_s6 + $0x8] sm:$0xff] }
  0x10   : > { %v1794_v20 = vpack.i.bf16 %v1747_v3, %v1741_v1  ;;  %v1843_v44 = vld [vmem:[%s1778_s6] sm:$0xff]  ;;  %s1688_s6 = smov 48  }
  0x11   : > { %1567 = vrot.lane.b32.xlu2 %v1753_v4, %s1680_s25 }
  0x17   : > { %291 = vrot.lane.b32.xlu0 %v1745_v2, %s1679_s24  ;;  %253 = vrot.lane.b32.xlu1 %v1747_v3, %s1679_s24 }
  0x1f   : > { %509 = vrot.lane.b32.xlu1 %v1741_v1, %s1681_s7  ;;  %1572 = vrot.lane.b32.xlu0 %v1794_v20, %s1680_s25 }
  0x27   : > { %546 = vrot.lane.b32.xlu1 %v1745_v2, %s1681_s7  ;;  %550 = vrot.lane.b32.xlu0 %v1745_v2, %s1683_s9 }
  0x2f   : > { %768 = vrot.lane.b32.xlu1 %v1741_v1, %s1682_s8 }
  0x6b   : > { %v1568_v12 = vpop.permute.xlu2 %1567 }
  0x6c   : > { %v1569_v14 = vunpack.i.l.bf16 %v1568_v12  ;;  %v1570_v15 = vunpack.i.h.bf16 %v1568_v12 }
  0x6e   : > { %1542 = vmatpush.msra.mxu3 %v1569_v14 }
  0x70   : > { %1543 = vmatpush.msra.mxu3 %v1570_v15 }
  0x81   : > { %v294_v5 = vpop.permute.xlu0 %293  ;;  %v256_v6 = vpop.permute.xlu1 %255 }
  0x82   : > { %1481 = vmatpush.xpose.msk.msra.mxu1 %vm257_vm0, %v294_v5  ;;  %1477 = vmatpush.xpose.msk.msra.mxu0 %vm257_vm0, %v256_v6 }
  0x89   : > { %v292_v7 = vpop.permute.xlu0 %291  ;;  %v254_v8 = vpop.permute.xlu1 %253 }
  0x8a   : > { %1482 = vmatpush.xpose.msk.msra.mxu1 %vm257_vm0, %v292_v7  ;;  %1478 = vmatpush.xpose.msk.msra.mxu0 %vm257_vm0, %v254_v8 }
  0x8d   : > { %1483 = vmatmul.msk.f32.vlgmr.msra.gmra.mxu1 %vm257_vm0, %v1745_v2  ;;  %1479 = vmatmul.msk.f32.vlgmr.msra.gmra.mxu0 %vm257_vm0, %v1747_v3 }
  0x8e   : > { %498 = vmatpush.msrb.mxu1 %v1569_v14 }
  0x90   : > { %499 = vmatpush.msrb.mxu1 %v1570_v15 }
  0x91   : > { %v1573_v38 = vpop.permute.xlu0 %1572  ;;  %v510_v5 = vpop.permute.xlu1 %509 }
  0x92   : > { %v1574_v39 = vunpack.i.l.bf16 %v1573_v38  ;;  %v1575_v47 = vunpack.i.h.bf16 %v1573_v38 }
  0x94   : > { %463 = vmatpush.msrb.mxu0 %v1574_v39  ;;  %1540 = vmatpush.msra.mxu2 %v1574_v39 }
  0x95   : > { %1484 = vmatmul.msk.f32.gmra.mxu1 %vm257_vm0, %v1739_v0  ;;  %1480 = vmatmul.msk.f32.gmra.mxu0 %vm257_vm0, %v1741_v1 }
  0x96   : > { %464 = vmatpush.msrb.mxu0 %v1575_v47  ;;  %1541 = vmatpush.msra.mxu2 %v1575_v47 }
  0x99   : > { %v551_v48 = vpop.permute.xlu0 %550  ;;  %v547_v8 = vpop.permute.xlu1 %546 }
 0x10a   : > { %v1769_v9 = vpop.f32.mrf.mxu1  ;;  %v283_v21 = vpop.f32.mrf.mxu0 }
 0x10b   : > { %v326_v40 = vmul.f32 0.35355338, %v283_v21 }
 0x10d   : > { %v332_v42 = vadd.f32 %v330_v41, %v326_v40 }
 0x10f   : > { %v1846_v45 = vadd.f32 %v332_v42, %v1843_v44 }
 0x111   : > { %v341_v46 = vsel %vm340_vm1, %v1846_v45, -inf }
 0x112   : > { %v323_v10 = vpop.f32.mrf.mxu1  ;;  %v286_v22 = vpop.f32.mrf.mxu0 }
 0x113   : > { %v329_v13 = vmul.f32 0.35355338, %v323_v10  ;;  %v327_v23 = vmul.f32 0.35355338, %v286_v22 }
 0x115   : > { %v335_v17 = vadd.f32 %v331_v11, %v329_v13  ;;  %v333_v24 = vadd.f32 %v331_v11, %v327_v23  ;;  %v769_v11 = vpop.permute.xlu1 %768 }
 0x117   : > { %v339_v18 = vadd.f32 %v335_v17, %v1781_v16  ;;  %v337_v25 = vadd.f32 %v333_v24, %v1781_v16 }
 0x119   : > { %v350_v19 = vsel %vm340_vm1, %v339_v18, -inf  ;;  %v344_v26 = vsel %vm340_vm1, %v337_v25, -inf }
 0x11a   : > { %351 = vmax.xlane.f32.xlu2 %v350_v19 }
 0x132   : > { %513 = vrot.lane.b32.xlu2 %v1741_v1, %s1683_s9 }
 0x15b   : > { %345 = vmax.xlane.f32.xlu2 %v344_v26 }
 0x173   : > { %511 = vrot.lane.b32.xlu2 %v1747_v3, %s1683_s9 }
 0x17b   : > { %507 = vrot.lane.b32.xlu2 %v1747_v3, %s1681_s7 }
 0x183   : > { %552 = vrot.lane.b32.xlu2 %v1739_v0, %s1683_s9  ;;  %s1691_s9 = smov 16  }
 0x18b   : > { %772 = vrot.lane.b32.xlu2 %v1741_v1, %s1684_s10 }
 0x18d   : > { %v352_v27 = vpop.xlane.xlu2 %351 }
 0x18e   : > { %v356_v28 = vsub.f32 %v339_v18, %v352_v27 }
 0x190   : > { %v363_v29 = vmul.f32 1.442695, %v356_v28 }
 0x192   : > { %1607 = vpow2.f32 %v363_v29 }
 0x193   : > { %770 = vrot.lane.b32.xlu2 %v1747_v3, %s1684_s10 }
 0x195   : > { %v514_v30 = vpop.permute.xlu2 %513 }
 0x196   : > { %1489 = vmatpush.xpose.msk.msrb.mxu3 %vm257_vm0, %v514_v30 }
 0x198   : > { %v1810_v31 = vpop.eup %1607 }
 0x199   : > { %v374_v32 = vsel %vm340_vm1, %v1810_v31, 0.0 }
 0x19a   : > { %375 = vadd.xlane.f32.xlu0 %v374_v32 }
 0x19b   : > { %548 = vrot.lane.b32.xlu2 %v1739_v0, %s1681_s7  ;;  %s1689_s7 = smov 40  }
 0x1a3   : > { %1031 = vrot.lane.b32.xlu2 %v1741_v1, %s1685_s11 }
 0x1ab   : > { %805 = vrot.lane.b32.xlu2 %v1745_v2, %s1682_s8 }
 0x1ae   : > { %766 = vrot.lane.b32.xlu0 %v1747_v3, %s1682_s8 }
 0x1b3   : > { %1027 = vrot.lane.b32.xlu2 %v1741_v1, %s1686_s12  ;;  %v328_v1 = vmul.f32 0.35355338, %v1769_v9 }
 0x1b6   : > { %811 = vrot.lane.b32.xlu0 %v1739_v0, %s1684_s10 }
 0x1bb   : > { %1064 = vrot.lane.b32.xlu2 %v1745_v2, %s1686_s12 }
 0x1be   : > { %1029 = vrot.lane.b32.xlu0 %v1747_v3, %s1685_s11 }
 0x1c6   : > { %807 = vrot.lane.b32.xlu0 %v1739_v0, %s1682_s8  ;;  %s1690_s8 = smov 8  }
 0x1ce   : > { %1068 = vrot.lane.b32.xlu0 %v1745_v2, %s1685_s11  ;;  %v346_v33 = vpop.xlane.xlu2 %345 }
 0x1cf   : > { %v354_v34 = vsub.f32 %v337_v25, %v346_v33 }
 0x1d1   : > { %v359_v35 = vmul.f32 1.442695, %v354_v34 }
 0x1d3   : > { %1609 = vpow2.f32 %v359_v35 }
 0x1d6   : > { %v512_v43 = vpop.permute.xlu2 %511 }
 0x1d7   : > { %1490 = vmatpush.xpose.msk.msrb.mxu3 %vm257_vm0, %v512_v43 }
 0x1d9   : > { %v1834_v36 = vpop.eup %1609 }
 0x1da   : > { %v368_v37 = vsel %vm340_vm1, %v1834_v36, 0.0 }
 0x1db   : > { %369 = vadd.xlane.f32.xlu1 %v368_v37 }
 0x1de   : > { %v508_v49 = vpop.permute.xlu2 %507 }
 0x1e6   : > { %v553_v51 = vpop.permute.xlu2 %552 }
 0x1ee   : > { %v773_v58 = vpop.permute.xlu2 %772 }
 0x1ef   : > { %1503 = vmatpush.xpose.msk.msrb.mxu2 %vm257_vm0, %v773_v58 }
 0x1f4   : > { %809 = vrot.lane.b32.xlu1 %v1745_v2, %s1684_s10  ;;  %s1692_s10 = smov 24  }
 0x1f6   : > { %v771_v9 = vpop.permute.xlu2 %770 }
 0x1f7   : > { %1504 = vmatpush.xpose.msk.msrb.mxu2 %vm257_vm0, %v771_v9 }
 0x1f8   : > { %342 = vmax.xlane.f32.xlu0 %v341_v46 }
 0x1fc   : > { %1025 = vrot.lane.b32.xlu1 %v1747_v3, %s1686_s12  ;;  %v334_v3 = vadd.f32 %v330_v41, %v328_v1 }
 0x1fe   : > { %v1868_v6 = vadd.f32 %v334_v3, %v1843_v44  ;;  %v549_v10 = vpop.permute.xlu2 %548 }
 0x200   : > { %v347_v7 = vsel %vm340_vm1, %v1868_v6, -inf }
 0x204   : > { %1070 = vrot.lane.b32.xlu1 %v1739_v0, %s1685_s11 }
 0x206   : > { %v1032_v25 = vpop.permute.xlu2 %1031 }
 0x20c   : > { %1066 = vrot.lane.b32.xlu1 %v1739_v0, %s1686_s12 }
 0x20d   : > { %v376_v50 = vpop.xlane.xlu0 %375 }
 0x20e   : > { %1611 = vrcp.f32 %v376_v50  ;;  %v433_v55 = vand.u32 2147483648, %v376_v50  ;;  %v431_v57 = vand.u32 2147483647, %v376_v50  ;;  %vm427_vm3 = vweird.f32 %v376_v50 }
 0x210   : > { %v434_v60 = vor.u32 1.1754944e-38, %v433_v55  ;;  %vm432_vm5 = vcmp.eq.f32.partialorder %v431_v57, 8.507059e+37 }
 0x214   : > { %v1612_v52 = vpop.eup %1611 }
 0x215   : > { %v423_v53 = vmul.f32 %v1612_v52, %v376_v50  ;;  %vm428_vm2 = vweird.f32 %v1612_v52 }
 0x216   : > { %vm429_vm4 = vmor %vm427_vm3, %vm428_vm2 }
 0x217   : > { %v424_v54 = vsub.f32 1.0, %v423_v53  ;;  %v1908_v53 = vld [vmem:[%s2189_s1 + $0x18] sm:$0xff] }
 0x219   : > { %v425_v56 = vmul.f32 %v1612_v52, %v424_v54 }
 0x21b   : > { %v426_v59 = vadd.f32 %v1612_v52, %v425_v56 }
 0x21d   : > { %v430_v61 = vsel %vm429_vm4, %v1612_v52, %v426_v59 }
 0x21e   : > { %v435_v62 = vsel %vm432_vm5, %v434_v60, %v430_v61 }
 0x21f   : > { %v436_v63 = vmul.f32 %v1810_v31, %v435_v62  ;;  %v806_v31 = vpop.permute.xlu2 %805 }
 0x220   : > { %v767_v0 = vpop.permute.xlu0 %766 }
 0x221   : > { %1488 = vmatmul.msk.f32.vlgmr.msra.gmra.mxu3 %vm340_vm1, %v436_v63 }
 0x222   : > { %1493 = vmatpush.xpose.msk.msra.mxu3 %vm257_vm0, %v553_v51 }
 0x226   : > { %1494 = vmatpush.xpose.msk.msra.mxu3 %vm257_vm0, %v551_v48 }
 0x228   : > { %v812_v2 = vpop.permute.xlu0 %811 }
 0x229   : > { %1491 = vmatmul.msk.f32.vlgmr.msrb.gmra.mxu3 %vm257_vm0, %v508_v49  ;;  %v1497_v49 = vld [vmem:[%s2189_s1 + $0x10] sm:$0xff] }
 0x22a   : > { %1507 = vmatpush.xpose.msk.msrb.mxu3 %vm257_vm0, %v812_v2  ;;  %v1511_v2 = vld [vmem:[%s2189_s1 + $0x20] sm:$0xff] }
 0x230   : > { %v1030_v12 = vpop.permute.xlu0 %1029 }
 0x231   : > { %1492 = vmatmul.msk.f32.gmra.mxu3 %vm257_vm0, %v510_v5 }
 0x236   : > { %348 = vmax.xlane.f32.xlu1 %v347_v7 }
 0x238   : > { %v808_v17 = vpop.permute.xlu0 %807 }
 0x239   : > { %1495 = vmatmul.msk.f32.vlgmr.msra.gmra.mxu3 %vm257_vm0, %v547_v8 }
 0x240   : > { %v1069_v29 = vpop.permute.xlu0 %1068 }
 0x241   : > { %1496 = vmatmul.msk.f32.gmra.mxu3 %vm257_vm0, %v549_v10 }
 0x24e   : > { %v370_v13 = vpop.xlane.xlu1 %369 }
 0x24f   : > { %1613 = vrcp.f32 %v370_v13  ;;  %v403_v19 = vand.u32 2147483648, %v370_v13  ;;  %v401_v22 = vand.u32 2147483647, %v370_v13  ;;  %vm397_vm7 = vweird.f32 %v370_v13  ;;  %1577 = vrot.lane.b32.xlu1 %v1794_v20, %s1687_s15 }
 0x251   : > { %v404_v24 = vor.u32 1.1754944e-38, %v403_v19  ;;  %vm402_vm9 = vcmp.eq.f32.partialorder %v401_v22, 8.507059e+37 }
 0x255   : > { %v1614_v14 = vpop.eup %1613 }
 0x256   : > { %v393_v15 = vmul.f32 %v1614_v14, %v370_v13  ;;  %vm398_vm6 = vweird.f32 %v1614_v14  ;;  %v1512_v13 = vld [vmem:[%s2189_s1 + $0x28] sm:$0xff] }
 0x257   : > { %vm399_vm8 = vmor %vm397_vm7, %vm398_vm6 }
 0x258   : > { %v394_v18 = vsub.f32 1.0, %v393_v15 }
 0x25a   : > { %v395_v21 = vmul.f32 %v1614_v14, %v394_v18 }
 0x25c   : > { %v396_v23 = vadd.f32 %v1614_v14, %v395_v21 }
 0x25e   : > { %v400_v26 = vsel %vm399_vm8, %v1614_v14, %v396_v23 }
 0x25f   : > { %v405_v27 = vsel %vm402_vm9, %v404_v24, %v400_v26 }
 0x260   : > { %v406_v28 = vmul.f32 %v1834_v36, %v405_v27  ;;  %v1028_v36 = vpop.permute.xlu2 %1027 }
 0x262   : > { %1486 = vmatmul.msk.f32.vlgmr.msra.gmra.mxu2 %vm340_vm1, %v406_v28 }
 0x263   : > { %1517 = vmatpush.xpose.msk.msra.mxu2 %vm257_vm0, %v1032_v25 }
 0x266   : > { %v810_v30 = vpop.permute.xlu1 %809 }
 0x267   : > { %1508 = vmatpush.xpose.msk.msrb.mxu3 %vm257_vm0, %v810_v30  ;;  %1518 = vmatpush.xpose.msk.msra.mxu2 %vm257_vm0, %v1030_v12 }
 0x268   : > { %v1065_v40 = vpop.permute.xlu2 %1064 }
 0x26a   : > { %1505 = vmatmul.msk.f32.vlgmr.msrb.gmra.mxu2 %vm257_vm0, %v767_v0  ;;  %1509 = vmatmul.msk.f32.vlgmr.msrb.gmra.mxu3 %vm257_vm0, %v806_v31  ;;  %v1525_v31 = vld [vmem:[%s2189_s1 + $0x30] sm:$0xff] }
 0x26b   : > { %v343_v32 = vpop.xlane.xlu0 %342 }
 0x26c   : > { %v353_v33 = vsub.f32 %v1846_v45, %v343_v32 }
 0x26e   : > { %v357_v34 = vmul.f32 1.442695, %v353_v33  ;;  %v1026_v35 = vpop.permute.xlu1 %1025 }
 0x270   : > { %1615 = vpow2.f32 %v357_v34 }
 0x272   : > { %1506 = vmatmul.msk.f32.gmra.mxu2 %vm257_vm0, %v769_v11  ;;  %1510 = vmatmul.msk.f32.gmra.mxu3 %vm257_vm0, %v808_v17 }
 0x276   : > { %v1885_v37 = vpop.eup %1615  ;;  %v1071_v38 = vpop.permute.xlu1 %1070 }
 0x277   : > { %1521 = vmatpush.xpose.msk.msra.mxu3 %vm257_vm0, %v1071_v38  ;;  %v365_v39 = vsel %vm340_vm1, %v1885_v37, 0.0 }
 0x278   : > { %366 = vadd.xlane.f32.xlu0 %v365_v39 }
 0x27a   : > { %1519 = vmatmul.msk.f32.vlgmr.msra.gmra.mxu2 %vm257_vm0, %v1026_v35 }
 0x27b   : > { %1522 = vmatpush.xpose.msk.msra.mxu3 %vm257_vm0, %v1069_v29 }
 0x27e   : > { %1523 = vmatmul.msk.f32.vlgmr.msra.gmra.mxu3 %vm257_vm0, %v1065_v40  ;;  %v1067_v41 = vpop.permute.xlu1 %1066 }
 0x282   : > { %1520 = vmatmul.msk.f32.gmra.mxu2 %vm257_vm0, %v1028_v36 }
 0x286   : > { %1524 = vmatmul.msk.f32.gmra.mxu3 %vm257_vm0, %v1067_v41 }
 0x28c   : > { %1582 = vrot.lane.b32.xlu0 %v1753_v4, %s1687_s15 }
 0x2a4   : > { %v1897_v42 = vpop.f32.mrf.mxu3 }
 0x2a9   : > { %v349_v43 = vpop.xlane.xlu1 %348 }
 0x2aa   : > { %v355_v45 = vsub.f32 %v1868_v6, %v349_v43 }
 0x2ac   : > { %v361_v46 = vmul.f32 1.442695, %v355_v45  ;;  %v540_v47 = vpop.f32.mrf.mxu3 }
 0x2ad   : > { %v585_v48 = vmul.f32 0.35355338, %v540_v47 }
 0x2ae   : > { %1617 = vpow2.f32 %v361_v46 }
 0x2af   : > { %v592_v50 = vadd.f32 %v1497_v49, %v585_v48 }
 0x2b1   : > { %v1914_v57 = vadd.f32 %v592_v50, %v1843_v44  ;;  %v1526_v50 = vld [vmem:[%s2189_s1 + $0x38] sm:$0xff] }
 0x2b3   : > { %v600_v60 = vsel %vm340_vm1, %v1914_v57, -inf }
 0x2b4   : > { %v1903_v51 = vpop.eup %1617  ;;  %v543_v52 = vpop.f32.mrf.mxu3 }
 0x2b5   : > { %v586_v54 = vmul.f32 0.35355338, %v543_v52  ;;  %v371_v55 = vsel %vm340_vm1, %v1903_v51, 0.0 }
 0x2b6   : > { %372 = vadd.xlane.f32.xlu2 %v371_v55 }
 0x2b7   : > { %v593_v56 = vadd.f32 %v1908_v53, %v586_v54 }
 0x2b9   : > { %v1917_v58 = vadd.f32 %v593_v56, %v1781_v16 }
 0x2bb   : > { %v603_v59 = vsel %vm340_vm1, %v1917_v58, -inf }
 0x2bc   : > { %604 = vmax.xlane.f32.xlu0 %v603_v59  ;;  %v579_v61 = vpop.f32.mrf.mxu3 }
 0x2bd   : > { %v587_v21 = vmul.f32 0.35355338, %v579_v61 }
 0x2be   : > { %601 = vmax.xlane.f32.xlu2 %v600_v60 }
 0x2bf   : > { %v594_v27 = vadd.f32 %v1497_v49, %v587_v21 }
 0x2c1   : > { %v1947_v40 = vadd.f32 %v594_v27, %v1843_v44 }
 0x2c3   : > { %v606_v47 = vsel %vm340_vm1, %v1947_v40, -inf }
 0x2c4   : > { %v582_v62 = vpop.f32.mrf.mxu3 }
 0x2c5   : > { %v588_v38 = vmul.f32 0.35355338, %v582_v62 }
 0x2e5   : > { %v1923_v63 = vpop.f32.mrf.mxu2 }
 0x2eb   : > { %v367_v0 = vpop.xlane.xlu0 %366 }
 0x2ec   : > { %1619 = vrcp.f32 %v367_v0  ;;  %v388_v14 = vand.u32 2147483648, %v367_v0  ;;  %v386_v18 = vand.u32 2147483647, %v367_v0  ;;  %vm382_vm11 = vweird.f32 %v367_v0 }
 0x2ed   : > { %v799_v1 = vpop.f32.mrf.mxu2  ;;  %v838_v3 = vpop.f32.mrf.mxu3 }
 0x2ee   : > { %v844_v5 = vmul.f32 0.35355338, %v799_v1  ;;  %v389_v24 = vor.u32 1.1754944e-38, %v388_v14  ;;  %vm387_vm13 = vcmp.eq.f32.partialorder %v386_v18, 8.507059e+37  ;;  %v846_v52 = vmul.f32 0.35355338, %v838_v3  ;;  %v1578_v14 = vpop.permute.xlu1 %1577 }
 0x2f0   : > { %v851_v6 = vadd.f32 %v1511_v2, %v844_v5  ;;  %v853_v61 = vadd.f32 %v1511_v2, %v846_v52 }
 0x2f2   : > { %v1620_v7 = vpop.eup %1619  ;;  %v1929_v8 = vadd.f32 %v851_v6, %v1843_v44  ;;  %v1976_v2 = vadd.f32 %v853_v61, %v1843_v44 }
 0x2f3   : > { %v378_v9 = vmul.f32 %v1620_v7, %v367_v0  ;;  %vm383_vm10 = vweird.f32 %v1620_v7 }
 0x2f4   : > { %v859_v10 = vsel %vm340_vm1, %v1929_v8, -inf  ;;  %vm384_vm12 = vmor %vm382_vm11, %vm383_vm10 }
 0x2f5   : > { %v379_v11 = vsub.f32 1.0, %v378_v9  ;;  %860 = vmax.xlane.f32.xlu1 %v859_v10  ;;  %v802_v12 = vpop.f32.mrf.mxu2  ;;  %v841_v19 = vpop.f32.mrf.mxu3 }
 0x2f6   : > { %v845_v15 = vmul.f32 0.35355338, %v802_v12  ;;  %v847_v41 = vmul.f32 0.35355338, %v841_v19 }
 0x2f7   : > { %v380_v17 = vmul.f32 %v1620_v7, %v379_v11  ;;  %v865_v11 = vsel %vm340_vm1, %v1976_v2, -inf }
 0x2f8   : > { %v852_v22 = vadd.f32 %v1512_v13, %v845_v15  ;;  %v854_v48 = vadd.f32 %v1512_v13, %v847_v41  ;;  %v1580_v15 = vunpack.i.h.bf16 %v1578_v14 }
 0x2f9   : > { %v381_v23 = vadd.f32 %v1620_v7, %v380_v17  ;;  %v1579_v17 = vunpack.i.l.bf16 %v1578_v14 }
 0x2fa   : > { %v1937_v25 = vadd.f32 %v852_v22, %v1781_v16  ;;  %v1964_v60 = vadd.f32 %v854_v48, %v1781_v16 }
 0x2fb   : > { %v385_v26 = vsel %vm384_vm12, %v1620_v7, %v381_v23  ;;  %722 = vmatpush.msra.mxu0 %v1579_v17 }
 0x2fc   : > { %v862_v28 = vsel %vm340_vm1, %v1937_v25, -inf  ;;  %v390_v29 = vsel %vm387_vm13, %v389_v24, %v385_v26  ;;  %v868_v7 = vsel %vm340_vm1, %v1964_v60, -inf }
 0x2fd   : > { %v1058_v30 = vpop.f32.mrf.mxu2  ;;  %863 = vmax.xlane.f32.xlu2 %v862_v28  ;;  %v391_v32 = vmul.f32 %v1885_v37, %v390_v29  ;;  %v595_v37 = vadd.f32 %v1908_v53, %v588_v38  ;;  %723 = vmatpush.msra.mxu0 %v1580_v15 }
 0x2fe   : > { %v1103_v33 = vmul.f32 0.35355338, %v1058_v30  ;;  %v1583_v34 = vpop.permute.xlu0 %1582 }
 0x2ff   : > { %1485 = vmatmul.msk.f32.vlgmr.msrb.gmra.mxu0 %vm340_vm1, %v391_v32  ;;  %v1585_v35 = vunpack.i.h.bf16 %v1583_v34  ;;  %v1584_v36 = vunpack.i.l.bf16 %v1583_v34  ;;  %v1961_v53 = vadd.f32 %v595_v37, %v1781_v16 }
 0x300   : > { %v1110_v39 = vadd.f32 %v1525_v31, %v1103_v33 }
 0x301   : > { %v1097_v43 = vpop.f32.mrf.mxu3  ;;  %757 = vmatpush.msra.mxu1 %v1584_v36  ;;  %v609_v5 = vsel %vm340_vm1, %v1961_v53, -inf }
 0x302   : > { %v1950_v45 = vadd.f32 %v1110_v39, %v1843_v44  ;;  %v1105_v55 = vmul.f32 0.35355338, %v1097_v43 }
 0x303   : > { %758 = vmatpush.msra.mxu1 %v1585_v35 }
 0x304   : > { %v1118_v46 = vsel %vm340_vm1, %v1950_v45, -inf  ;;  %v1112_v1 = vadd.f32 %v1525_v31, %v1105_v55 }
 0x305   : > { %1119 = vmax.xlane.f32.xlu0 %v1118_v46  ;;  %v1061_v49 = vpop.f32.mrf.mxu2  ;;  %607 = vmax.xlane.f32.xlu2 %v606_v47 }
 0x306   : > { %v1104_v54 = vmul.f32 0.35355338, %v1061_v49  ;;  %v1982_v10 = vadd.f32 %v1112_v1, %v1843_v44 }
 0x308   : > { %v1111_v56 = vadd.f32 %v1526_v50, %v1104_v54  ;;  %v1124_v13 = vsel %vm340_vm1, %v1982_v10, -inf }
 0x309   : > { %v1100_v59 = vpop.f32.mrf.mxu3 }
 0x30a   : > { %v1967_v62 = vadd.f32 %v1111_v56, %v1781_v16  ;;  %v1106_v0 = vmul.f32 0.35355338, %v1100_v59 }
 0x30c   : > { %v1121_v3 = vsel %vm340_vm1, %v1967_v62, -inf  ;;  %v1113_v6 = vadd.f32 %v1526_v50, %v1106_v0 }
 0x30d   : > { %610 = vmax.xlane.f32.xlu0 %v609_v5  ;;  %1122 = vmax.xlane.f32.xlu1 %v1121_v3 }
 0x30e   : > { %869 = vmax.xlane.f32.xlu2 %v868_v7  ;;  %v1979_v9 = vadd.f32 %v1113_v6, %v1781_v16 }
 0x310   : > { %v1127_v12 = vsel %vm340_vm1, %v1979_v9, -inf }
 0x315   : > { %866 = vmax.xlane.f32.xlu1 %v865_v11  ;;  %1128 = vmax.xlane.f32.xlu0 %v1127_v12 }
 0x316   : > { %1125 = vmax.xlane.f32.xlu2 %v1124_v13 }
 0x329   : > { %v373_v16 = vpop.xlane.xlu2 %372 }
 0x32a   : > { %1621 = vrcp.f32 %v373_v16  ;;  %v418_v24 = vand.u32 2147483648, %v373_v16  ;;  %v416_v29 = vand.u32 2147483647, %v373_v16  ;;  %vm412_vm15 = vweird.f32 %v373_v16 }
 0x32c   : > { %v419_v31 = vor.u32 1.1754944e-38, %v418_v24  ;;  %vm417_vm3 = vcmp.eq.f32.partialorder %v416_v29, 8.507059e+37 }
 0x32f   : > { %v605_v19 = vpop.xlane.xlu0 %604 }
 0x330   : > { %v1622_v44 = vpop.eup %1621  ;;  %v613_v26 = vsub.f32 %v1917_v58, %v605_v19 }
 0x331   : > { %v408_v18 = vmul.f32 %v1622_v44, %v373_v16  ;;  %v602_v21 = vpop.xlane.xlu2 %601  ;;  %vm413_vm14 = vweird.f32 %v1622_v44 }
 0x332   : > { %v612_v22 = vsub.f32 %v1914_v57, %v602_v21  ;;  %vm414_vm2 = vmor %vm412_vm15, %vm413_vm14  ;;  %v618_v32 = vmul.f32 1.442695, %v613_v26 }
 0x333   : > { %v409_v23 = vsub.f32 1.0, %v408_v18 }
 0x334   : > { %v616_v27 = vmul.f32 1.442695, %v612_v22 }
 0x335   : > { %v410_v28 = vmul.f32 %v1622_v44, %v409_v23 }
 0x336   : > { %1623 = vpow2.f32 %v616_v27 }
 0x337   : > { %v411_v30 = vadd.f32 %v1622_v44, %v410_v28  ;;  %1625 = vpow2.f32 %v618_v32 }
 0x339   : > { %v415_v33 = vsel %vm414_vm2, %v1622_v44, %v411_v30 }
 0x33a   : > { %v420_v34 = vsel %vm417_vm3, %v419_v31, %v415_v33 }
 0x33b   : > { %v421_v35 = vmul.f32 %v1903_v51, %v420_v34 }
 0x33c   : > { %v1993_v57 = vpop.eup %1623 }
 0x33d   : > { %1487 = vmatmul.msk.f32.vlgmr.msrb.gmra.mxu1 %vm340_vm1, %v421_v35  ;;  %v624_v58 = vsel %vm340_vm1, %v1993_v57, 0.0  ;;  %v1998_v36 = vpop.eup %1625 }
 0x33e   : > { %625 = vadd.xlane.f32.xlu1 %v624_v58  ;;  %v627_v38 = vsel %vm340_vm1, %v1998_v36, 0.0 }
 0x346   : > { %628 = vadd.xlane.f32.xlu1 %v627_v38 }
 0x35f   : > { %1592 = vrot.lane.b32.xlu1 %v1753_v4, %s1688_s6 }
 0x368   : > { %v861_v51 = vpop.xlane.xlu1 %860 }
 0x369   : > { %v871_v39 = vsub.f32 %v1929_v8, %v861_v51 }
 0x36b   : > { %v875_v41 = vmul.f32 1.442695, %v871_v39 }
 0x36d   : > { %1627 = vpow2.f32 %v875_v41 }
 0x370   : > { %v864_v43 = vpop.xlane.xlu2 %863 }
 0x371   : > { %v872_v37 = vsub.f32 %v1937_v25, %v864_v43 }
 0x373   : > { %v2006_v46 = vpop.eup %1627  ;;  %v877_v47 = vmul.f32 1.442695, %v872_v37 }
 0x374   : > { %v883_v48 = vsel %vm340_vm1, %v2006_v46, 0.0 }
 0x375   : > { %1629 = vpow2.f32 %v877_v47  ;;  %884 = vadd.xlane.f32.xlu2 %v883_v48 }
 0x378   : > { %v1120_v49 = vpop.xlane.xlu0 %1119  ;;  %v608_v50 = vpop.xlane.xlu2 %607 }
 0x379   : > { %v1130_v52 = vsub.f32 %v1950_v45, %v1120_v49  ;;  %v614_v54 = vsub.f32 %v1947_v40, %v608_v50 }
 0x37b   : > { %v2012_v8 = vpop.eup %1629  ;;  %v1134_v55 = vmul.f32 1.442695, %v1130_v52  ;;  %v620_v56 = vmul.f32 1.442695, %v614_v54 }
 0x37c   : > { %v886_v25 = vsel %vm340_vm1, %v2012_v8, 0.0 }
 0x37d   : > { %1631 = vpow2.f32 %v1134_v55  ;;  %887 = vadd.xlane.f32.xlu2 %v886_v25 }
 0x37e   : > { %1633 = vpow2.f32 %v620_v56 }
 0x380   : > { %v611_v59 = vpop.xlane.xlu0 %610  ;;  %v1123_v61 = vpop.xlane.xlu1 %1122 }
 0x381   : > { %v615_v0 = vsub.f32 %v1961_v53, %v611_v59  ;;  %v870_v1 = vpop.xlane.xlu2 %869  ;;  %v1131_v7 = vsub.f32 %v1967_v62, %v1123_v61 }
 0x382   : > { %v874_v5 = vsub.f32 %v1964_v60, %v870_v1 }
 0x383   : > { %v2018_v45 = vpop.eup %1631  ;;  %v622_v40 = vmul.f32 1.442695, %v615_v0  ;;  %v1136_v53 = vmul.f32 1.442695, %v1131_v7 }
 0x384   : > { %v2020_v3 = vpop.eup %1633  ;;  %v881_v6 = vmul.f32 1.442695, %v874_v5  ;;  %v1142_v11 = vsel %vm340_vm1, %v2018_v45, 0.0 }
 0x385   : > { %1635 = vpow2.f32 %v622_v40  ;;  %v630_v12 = vsel %vm340_vm1, %v2020_v3, 0.0  ;;  %1143 = vadd.xlane.f32.xlu2 %v1142_v11 }
 0x386   : > { %1637 = vpow2.f32 %v881_v6  ;;  %631 = vadd.xlane.f32.xlu0 %v630_v12 }
 0x387   : > { %1639 = vpow2.f32 %v1136_v53 }
 0x388   : > { %v867_v60 = vpop.xlane.xlu1 %866  ;;  %v1129_v27 = vpop.xlane.xlu0 %1128 }
 0x389   : > { %v873_v15 = vsub.f32 %v1976_v2, %v867_v60  ;;  %v1126_v21 = vpop.xlane.xlu2 %1125  ;;  %v1133_v31 = vsub.f32 %v1979_v9, %v1129_v27 }
 0x38a   : > { %v1132_v23 = vsub.f32 %v1982_v10, %v1126_v21 }
 0x38b   : > { %v2027_v13 = vpop.eup %1635  ;;  %v879_v16 = vmul.f32 1.442695, %v873_v15  ;;  %v1140_v35 = vmul.f32 1.442695, %v1133_v31 }
 0x38c   : > { %v2029_v14 = vpop.eup %1637  ;;  %v633_v62 = vsel %vm340_vm1, %v2027_v13, 0.0  ;;  %v1138_v26 = vmul.f32 1.442695, %v1132_v23 }
 0x38d   : > { %v892_v17 = vsel %vm340_vm1, %v2029_v14, 0.0  ;;  %v2036_v44 = vpop.eup %1639  ;;  %1641 = vpow2.f32 %v879_v16 }
 0x38e   : > { %634 = vadd.xlane.f32.xlu0 %v633_v62  ;;  %893 = vadd.xlane.f32.xlu1 %v892_v17  ;;  %v1145_v18 = vsel %vm340_vm1, %v2036_v44, 0.0 }
 0x393   : > { %v2040_v19 = vpop.eup %1641 }
 0x394   : > { %v889_v2 = vsel %vm340_vm1, %v2040_v19, 0.0 }
 0x396   : > { %1146 = vadd.xlane.f32.xlu0 %v1145_v18 }
 0x39d   : > { %1587 = vrot.lane.b32.xlu2 %v1794_v20, %s1688_s6 }
 0x39e   : > { %890 = vadd.xlane.f32.xlu0 %v889_v2 }
 0x3a7   : > { %1602 = vrot.lane.b32.xlu1 %v1753_v4, %s1689_s7 }
 0x3b1   : > { %v626_v22 = vpop.xlane.xlu1 %625 }
 0x3b2   : > { %1597 = vrot.lane.b32.xlu0 %v1794_v20, %s1689_s7  ;;  %1643 = vrcp.f32 %v626_v22  ;;  %v647_v32 = vand.u32 2147483648, %v626_v22  ;;  %v645_v4 = vand.u32 2147483647, %v626_v22  ;;  %vm641_vm5 = vweird.f32 %v626_v22 }
 0x3b4   : > { %v648_v10 = vor.u32 1.1754944e-38, %v647_v32  ;;  %vm646_vm7 = vcmp.eq.f32.partialorder %v645_v4, 8.507059e+37 }
 0x3b8   : > { %v1644_v24 = vpop.eup %1643 }
 0x3b9   : > { %v637_v28 = vmul.f32 %v1644_v24, %v626_v22  ;;  %v629_v29 = vpop.xlane.xlu1 %628  ;;  %vm642_vm4 = vweird.f32 %v1644_v24 }
 0x3ba   : > { %1645 = vrcp.f32 %v629_v29  ;;  %vm643_vm6 = vmor %vm641_vm5, %vm642_vm4  ;;  %v662_v43 = vand.u32 2147483648, %v629_v29  ;;  %v660_v48 = vand.u32 2147483647, %v629_v29  ;;  %vm656_vm9 = vweird.f32 %v629_v29 }
 0x3bb   : > { %v638_v30 = vsub.f32 1.0, %v637_v28  ;;  %1647 = vpow2.f32 %v1138_v26 }
 0x3bc   : > { %1649 = vpow2.f32 %v1140_v35  ;;  %v663_v50 = vor.u32 1.1754944e-38, %v662_v43  ;;  %vm661_vm11 = vcmp.eq.f32.partialorder %v660_v48, 8.507059e+37 }
 0x3bd   : > { %v639_v33 = vmul.f32 %v1644_v24, %v638_v30 }
 0x3bf   : > { %v640_v34 = vadd.f32 %v1644_v24, %v639_v33 }
 0x3c0   : > { %v1646_v20 = vpop.eup %1645 }
 0x3c1   : > { %v644_v58 = vsel %vm643_vm6, %v1644_v24, %v640_v34  ;;  %v652_v38 = vmul.f32 %v1646_v20, %v629_v29  ;;  %v2050_v51 = vpop.eup %1647  ;;  %vm657_vm8 = vweird.f32 %v1646_v20 }
 0x3c2   : > { %v649_v39 = vsel %vm646_vm7, %v648_v10, %v644_v58  ;;  %v1148_v47 = vsel %vm340_vm1, %v2050_v51, 0.0  ;;  %vm658_vm10 = vmor %vm656_vm9, %vm657_vm8  ;;  %v2056_v54 = vpop.eup %1649 }
 0x3c3   : > { %v653_v41 = vsub.f32 1.0, %v652_v38  ;;  %v650_v9 = vmul.f32 %v1993_v57, %v649_v39  ;;  %v1151_v56 = vsel %vm340_vm1, %v2056_v54, 0.0 }
 0x3c5   : > { %v654_v37 = vmul.f32 %v1646_v20, %v653_v41  ;;  %1499 = vmatmul.msk.f32.vlgmr.msra.gmra.mxu0 %vm340_vm1, %v650_v9 }
 0x3c6   : > { %1149 = vadd.xlane.f32.xlu2 %v1148_v47 }
 0x3c7   : > { %v655_v49 = vadd.f32 %v1646_v20, %v654_v37 }
 0x3c9   : > { %v659_v52 = vsel %vm658_vm10, %v1646_v20, %v655_v49 }
 0x3ca   : > { %v664_v57 = vsel %vm661_vm11, %v663_v50, %v659_v52 }
 0x3cb   : > { %v665_v55 = vmul.f32 %v1998_v36, %v664_v57 }
 0x3cd   : > { %1500 = vmatmul.msk.f32.gmra.mxu0 %vm340_vm1, %v665_v55 }
 0x3ce   : > { %1152 = vadd.xlane.f32.xlu2 %v1151_v56 }
 0x3d1   : > { %v1593_v25 = vpop.permute.xlu1 %1592 }
 0x3d2   : > { %v1595_v59 = vunpack.i.h.bf16 %v1593_v25  ;;  %v1594_v61 = vunpack.i.l.bf16 %v1593_v25 }
 0x3d4   : > { %1016 = vmatpush.msrb.mxu1 %v1594_v61 }
 0x3d6   : > { %1017 = vmatpush.msrb.mxu1 %v1595_v59 }
 0x3e8   : > { %v885_v0 = vpop.xlane.xlu2 %884 }
 0x3e9   : > { %1651 = vrcp.f32 %v885_v0  ;;  %v906_v62 = vand.u32 2147483648, %v885_v0  ;;  %vm900_vm13 = vweird.f32 %v885_v0  ;;  %v904_v17 = vand.u32 2147483647, %v885_v0 }
 0x3eb   : > { %v907_v2 = vor.u32 1.1754944e-38, %v906_v62  ;;  %vm905_vm15 = vcmp.eq.f32.partialorder %v904_v17, 8.507059e+37 }
 0x3ef   : > { %v1652_v1 = vpop.eup %1651 }
 0x3f0   : > { %v896_v5 = vmul.f32 %v1652_v1, %v885_v0  ;;  %v888_v40 = vpop.xlane.xlu2 %887  ;;  %vm901_vm12 = vweird.f32 %v1652_v1 }
 0x3f1   : > { %1653 = vrcp.f32 %v888_v40  ;;  %vm902_vm14 = vmor %vm900_vm13, %vm901_vm12  ;;  %v921_v29 = vand.u32 2147483648, %v888_v40  ;;  %vm915_vm3 = vweird.f32 %v888_v40  ;;  %v919_v4 = vand.u32 2147483647, %v888_v40 }
 0x3f2   : > { %v897_v6 = vsub.f32 1.0, %v896_v5 }
 0x3f3   : > { %v922_v58 = vor.u32 1.1754944e-38, %v921_v29  ;;  %vm920_vm8 = vcmp.eq.f32.partialorder %v919_v4, 8.507059e+37 }
 0x3f4   : > { %v898_v7 = vmul.f32 %v1652_v1, %v897_v6 }
 0x3f6   : > { %v899_v60 = vadd.f32 %v1652_v1, %v898_v7 }
 0x3f7   : > { %v1654_v36 = vpop.eup %1653 }
 0x3f8   : > { %v911_v11 = vmul.f32 %v1654_v36, %v888_v40  ;;  %v2062_v12 = vpop.xlane.xlu2 %1143  ;;  %v903_v16 = vsel %vm902_vm14, %v1652_v1, %v899_v60  ;;  %vm916_vm2 = vweird.f32 %v1654_v36 }
 0x3f9   : > { %v632_v53 = vpop.xlane.xlu0 %631  ;;  %v908_v23 = vsel %vm905_vm15, %v907_v2, %v903_v16  ;;  %vm2065_vm5 = vmor %vm915_vm3, %vm916_vm2  ;;  %vm1159_vm3 = vweird.f32 %v2062_v12  ;;  %v1163_v29 = vand.u32 2147483647, %v2062_v12 }
 0x3fa   : > { %v912_v15 = vsub.f32 1.0, %v911_v11  ;;  %1655 = vrcp.f32 %v632_v53  ;;  %v677_v32 = vand.u32 2147483648, %v632_v53  ;;  %v909_v33 = vmul.f32 %v2006_v46, %v908_v23 }
 0x3fb   : > { %v675_v20 = vand.u32 2147483647, %v632_v53  ;;  %vm671_vm6 = vweird.f32 %v632_v53 }
 0x3fc   : > { %v913_v18 = vmul.f32 %v1654_v36, %v912_v15  ;;  %v678_v46 = vor.u32 1.1754944e-38, %v677_v32 }
 0x3fd   : > { %vm676_vm9 = vcmp.eq.f32.partialorder %v675_v20, 8.507059e+37 }
 0x3fe   : > { %v914_v28 = vadd.f32 %v1654_v36, %v913_v18 }
 0x400   : > { %v1656_v21 = vpop.eup %1655  ;;  %v1588_v22 = vpop.permute.xlu2 %1587  ;;  %v918_v10 = vsel %vm2065_vm5, %v1654_v36, %v914_v28 }
 0x401   : > { %v667_v24 = vmul.f32 %v1656_v21, %v632_v53  ;;  %v635_v26 = vpop.xlane.xlu0 %634  ;;  %v1589_v27 = vunpack.i.l.bf16 %v1588_v22  ;;  %v1590_v31 = vunpack.i.h.bf16 %v1588_v22  ;;  %vm672_vm4 = vweird.f32 %v1656_v21  ;;  %v2073_v43 = vpop.xlane.xlu1 %893 }
 0x402   : > { %1657 = vrcp.f32 %v635_v26  ;;  %vm673_vm7 = vmor %vm671_vm6, %vm672_vm4  ;;  %v923_v47 = vsel %vm920_vm8, %v922_v58, %v918_v10  ;;  %v692_v55 = vand.u32 2147483648, %v635_v26  ;;  %v690_v25 = vand.u32 2147483647, %v635_v26 }
 0x403   : > { %v668_v30 = vsub.f32 1.0, %v667_v24  ;;  %981 = vmatpush.msrb.mxu0 %v1589_v27  ;;  %1659 = vrcp.f32 %v2062_v12  ;;  %v924_v52 = vmul.f32 %v2012_v8, %v923_v47  ;;  %vm686_vm11 = vweird.f32 %v635_v26 }
 0x404   : > { %1661 = vrcp.f32 %v2073_v43  ;;  %v693_v61 = vor.u32 1.1754944e-38, %v692_v55  ;;  %vm691_vm13 = vcmp.eq.f32.partialorder %v690_v25, 8.507059e+37  ;;  %v1165_v27 = vand.u32 2147483648, %v2062_v12 }
 0x405   : > { %v669_v34 = vmul.f32 %v1656_v21, %v668_v30  ;;  %982 = vmatpush.msrb.mxu0 %v1590_v31  ;;  %vm945_vm8 = vweird.f32 %v2073_v43  ;;  %v949_v58 = vand.u32 2147483647, %v2073_v43 }
 0x406   : > { %1513 = vmatmul.msk.f32.vlgmr.msrb.gmra.mxu0 %vm340_vm1, %v909_v33  ;;  %v1166_v35 = vor.u32 1.1754944e-38, %v1165_v27 }
 0x407   : > { %v670_v38 = vadd.f32 %v1656_v21, %v669_v34  ;;  %v951_v34 = vand.u32 2147483648, %v2073_v43 }
 0x408   : > { %v1658_v39 = vpop.eup %1657 }
 0x409   : > { %v674_v41 = vsel %vm673_vm7, %v1656_v21, %v670_v38  ;;  %v682_v9 = vmul.f32 %v1658_v39, %v635_v26  ;;  %v2075_v37 = vpop.xlane.xlu0 %1146  ;;  %vm687_vm10 = vweird.f32 %v1658_v39  ;;  %v2081_v56 = vpop.eup %1659  ;;  %v952_v47 = vor.u32 1.1754944e-38, %v951_v34  ;;  %v1346_v34 = vld [vmem:[%s2191_s3 + $0x8] sm:$0xff] }
 0x40a   : > { %v679_v48 = vsel %vm676_vm9, %v678_v46, %v674_v41  ;;  %vm688_vm12 = vmor %vm686_vm11, %vm687_vm10  ;;  %1663 = vrcp.f32 %v2075_v37  ;;  %v2085_v1 = vpop.eup %1661  ;;  %v1155_v8 = vmul.f32 %v2081_v56, %v2062_v12  ;;  %vm1160_vm15 = vweird.f32 %v2081_v56 }
 0x40b   : > { %v683_v49 = vsub.f32 1.0, %v682_v9  ;;  %v680_v50 = vmul.f32 %v2020_v3, %v679_v48  ;;  %v941_v6 = vmul.f32 %v2085_v1, %v2073_v43  ;;  %vm2104_vm5 = vmor %vm1159_vm3, %vm1160_vm15  ;;  %vm946_vm7 = vweird.f32 %v2085_v1 }
 0x40c   : > { %v1156_v7 = vsub.f32 1.0, %v1155_v8  ;;  %vm1164_vm9 = vcmp.eq.f32.partialorder %v1163_v29, 8.507059e+37  ;;  %vm947_vm10 = vmor %vm945_vm8, %vm946_vm7 }
 0x40d   : > { %v684_v57 = vmul.f32 %v1658_v39, %v683_v49  ;;  %1501 = vmatmul.msk.f32.vlgmr.msra.gmra.mxu1 %vm340_vm1, %v680_v50  ;;  %v942_v53 = vsub.f32 1.0, %v941_v6  ;;  %v1180_v49 = vand.u32 2147483648, %v2075_v37  ;;  %v1178_v50 = vand.u32 2147483647, %v2075_v37 }
 0x40e   : > { %1514 = vmatmul.msk.f32.gmra.mxu0 %vm340_vm1, %v924_v52  ;;  %v1157_v62 = vmul.f32 %v2081_v56, %v1156_v7 }
 0x40f   : > { %v685_v59 = vadd.f32 %v1658_v39, %v684_v57  ;;  %v943_v21 = vmul.f32 %v2085_v1, %v942_v53  ;;  %v1181_v57 = vor.u32 1.1754944e-38, %v1180_v49  ;;  %vm1179_vm15 = vcmp.eq.f32.partialorder %v1178_v50, 8.507059e+37 }
 0x410   : > { %v2093_v36 = vpop.eup %1663  ;;  %v1158_v24 = vadd.f32 %v2081_v56, %v1157_v62 }
 0x411   : > { %v891_v3 = vpop.xlane.xlu0 %890  ;;  %v689_v0 = vsel %vm688_vm12, %v1658_v39, %v685_v59  ;;  %v1170_v17 = vmul.f32 %v2093_v36, %v2075_v37  ;;  %v944_v33 = vadd.f32 %v2085_v1, %v943_v21  ;;  %vm1175_vm11 = vweird.f32 %v2093_v36  ;;  %v2132_v59 = vpop.f32.mrf.mxu0 }
 0x412   : > { %1665 = vrcp.f32 %v891_v3  ;;  %v694_v5 = vsel %vm691_vm13, %v693_v61, %v689_v0  ;;  %v936_v2 = vand.u32 2147483648, %v891_v3  ;;  %v934_v23 = vand.u32 2147483647, %v891_v3 }
 0x413   : > { %v695_v40 = vmul.f32 %v2027_v13, %v694_v5  ;;  %v1171_v26 = vsub.f32 1.0, %v1170_v17  ;;  %vm930_vm2 = vweird.f32 %v891_v3  ;;  %v1162_v4 = vsel %vm2104_vm5, %v2081_v56, %v1158_v24 }
 0x414   : > { %v937_v30 = vor.u32 1.1754944e-38, %v936_v2  ;;  %vm935_vm6 = vcmp.eq.f32.partialorder %v934_v23, 8.507059e+37  ;;  %v1167_v39 = vsel %vm1164_vm9, %v1166_v35, %v1162_v4  ;;  %v948_v9 = vsel %vm947_vm10, %v2085_v1, %v944_v33  ;;  %v1348_v33 = vld [vmem:[%s2191_s3 + $0x18] sm:$0xff]  ;;  %v1347_v4 = vld [vmem:[%s2191_s3 + $0x10] sm:$0xff] }
 0x415   : > { %1502 = vmatmul.msk.f32.gmra.mxu1 %vm340_vm1, %v695_v40  ;;  %v1172_v12 = vmul.f32 %v2093_v36, %v1171_v26  ;;  %vm950_vm12 = vcmp.eq.f32.partialorder %v949_v58, 8.507059e+37  ;;  %vm1174_vm13 = vweird.f32 %v2075_v37  ;;  %1378 = vmatpush.msrb.mxu2 %v1348_v33  ;;  %vm1340_vm10 = vcmask 195584  }
 0x416   : > { %v953_v43 = vsel %vm950_vm12, %v952_v47, %v948_v9 }
 0x417   : > { %v1173_v48 = vadd.f32 %v2093_v36, %v1172_v12  ;;  %v954_v55 = vmul.f32 %v2029_v14, %v953_v43  ;;  %1379 = vmatpush.msrb.mxu2 %v1347_v4  ;;  %v1345_v12 = vld [vmem:[%s2191_s3] sm:$0xff] }
 0x418   : > { %v1666_v11 = vpop.eup %1665 }
 0x419   : > { %v926_v60 = vmul.f32 %v1666_v11, %v891_v3  ;;  %v1603_v15 = vpop.permute.xlu1 %1602  ;;  %vm931_vm14 = vweird.f32 %v1666_v11  ;;  %1380 = vmatpush.msrb.mxu2 %v1346_v34 }
 0x41a   : > { %v1605_v16 = vunpack.i.h.bf16 %v1603_v15  ;;  %v1604_v18 = vunpack.i.l.bf16 %v1603_v15  ;;  %vm932_vm4 = vmor %vm930_vm2, %vm931_vm14 }
 0x41b   : > { %v927_v13 = vsub.f32 1.0, %v926_v60  ;;  %vm1176_vm14 = vmor %vm1174_vm13, %vm1175_vm11  ;;  %1381 = vmatpush.msrb.mxu2 %v1345_v12  ;;  %vm1353_vm11 = vcmask 261120  }
 0x41c   : > { %1275 = vmatpush.msra.mxu1 %v1604_v18  ;;  %v1177_v52 = vsel %vm1176_vm14, %v2093_v36, %v1173_v48 }
 0x41d   : > { %v928_v22 = vmul.f32 %v1666_v11, %v927_v13  ;;  %v1182_v56 = vsel %vm1179_vm15, %v1181_v57, %v1177_v52 }
 0x41e   : > { %1276 = vmatpush.msra.mxu1 %v1605_v16  ;;  %v1183_v25 = vmul.f32 %v2036_v44, %v1182_v56 }
 0x41f   : > { %v929_v28 = vadd.f32 %v1666_v11, %v928_v22 }
 0x421   : > { %v933_v32 = vsel %vm932_vm4, %v1666_v11, %v929_v28 }
 0x422   : > { %v938_v20 = vsel %vm935_vm6, %v937_v30, %v933_v32 }
 0x423   : > { %v939_v10 = vmul.f32 %v2040_v19, %v938_v20  ;;  %v1168_v19 = vmul.f32 %v2018_v45, %v1167_v39 }
 0x424   : > { %v1598_v38 = vpop.permute.xlu0 %1597 }
 0x425   : > { %v1600_v46 = vunpack.i.h.bf16 %v1598_v38  ;;  %v1599_v41 = vunpack.i.l.bf16 %v1598_v38  ;;  %1515 = vmatmul.msk.f32.vlgmr.msrb.gmra.mxu1 %vm340_vm1, %v939_v10 }
 0x427   : > { %1240 = vmatpush.msra.mxu0 %v1599_v41 }
 0x429   : > { %1241 = vmatpush.msra.mxu0 %v1600_v46 }
 0x42a   : > { %1527 = vmatmul.msk.f32.vlgmr.msra.gmra.mxu0 %vm340_vm1, %v1168_v19 }
 0x42d   : > { %1516 = vmatmul.msk.f32.gmra.mxu1 %vm340_vm1, %v954_v55 }
 0x432   : > { %1528 = vmatmul.msk.f32.gmra.mxu0 %vm340_vm1, %v1183_v25 }
 0x439   : > { %v1150_v45 = vpop.xlane.xlu2 %1149 }
 0x43a   : > { %1667 = vrcp.f32 %v1150_v45  ;;  %v1195_v14 = vand.u32 2147483648, %v1150_v45  ;;  %v1193_v5 = vand.u32 2147483647, %v1150_v45  ;;  %vm1189_vm3 = vweird.f32 %v1150_v45 }
 0x43c   : > { %v1196_v6 = vor.u32 1.1754944e-38, %v1195_v14  ;;  %vm1194_vm5 = vcmp.eq.f32.partialorder %v1193_v5, 8.507059e+37 }
 0x440   : > { %v1668_v37 = vpop.eup %1667 }
 0x441   : > { %v1185_v61 = vmul.f32 %v1668_v37, %v1150_v45  ;;  %v1153_v3 = vpop.xlane.xlu2 %1152  ;;  %vm1190_vm2 = vweird.f32 %v1668_v37 }
 0x442   : > { %1669 = vrcp.f32 %v1153_v3  ;;  %v725_v0 = vpop.f32.mrf.mxu0  ;;  %vm1191_vm4 = vmor %vm1189_vm3, %vm1190_vm2  ;;  %v1210_v15 = vand.u32 2147483648, %v1153_v3  ;;  %v1208_v17 = vand.u32 2147483647, %v1153_v3  ;;  %vm1204_vm7 = vweird.f32 %v1153_v3 }
 0x443   : > { %v1186_v1 = vsub.f32 1.0, %v1185_v61  ;;  %1288 = vrot.lane.b32.xlu2 %v725_v0, %s1690_s8  ;;  %v1606_v61 = vld [vmem:[%s2192_s4] ss:$0 sm:$0xff] }
 0x444   : > { %v1211_v18 = vor.u32 1.1754944e-38, %v1210_v15  ;;  %vm1209_vm9 = vcmp.eq.f32.partialorder %v1208_v17, 8.507059e+37 }
 0x445   : > { %v1187_v8 = vmul.f32 %v1668_v37, %v1186_v1 }
 0x447   : > { %v1188_v44 = vadd.f32 %v1668_v37, %v1187_v8 }
 0x448   : > { %v1670_v40 = vpop.eup %1669 }
 0x449   : > { %v1192_v7 = vsel %vm1191_vm4, %v1668_v37, %v1188_v44  ;;  %v1200_v36 = vmul.f32 %v1670_v40, %v1153_v3  ;;  %vm1205_vm6 = vweird.f32 %v1670_v40 }
 0x44a   : > { %v1197_v11 = vsel %vm1194_vm5, %v1196_v6, %v1192_v7  ;;  %vm1206_vm8 = vmor %vm1204_vm7, %vm1205_vm6  ;;  %v728_v22 = vpop.f32.mrf.mxu0 }
 0x44b   : > { %v1201_v53 = vsub.f32 1.0, %v1200_v36  ;;  %v1198_v60 = vmul.f32 %v2050_v51, %v1197_v11  ;;  %v501_v51 = vpop.f32.mrf.mxu1 }
 0x44d   : > { %v1202_v62 = vmul.f32 %v1670_v40, %v1201_v53  ;;  %1529 = vmatmul.msk.f32.vlgmr.msra.gmra.mxu1 %vm340_vm1, %v1198_v60 }
 0x44f   : > { %v1203_v16 = vadd.f32 %v1670_v40, %v1202_v62 }
 0x451   : > { %v1207_v13 = vsel %vm1206_vm8, %v1670_v40, %v1203_v16 }
 0x452   : > { %v1212_v2 = vsel %vm1209_vm9, %v1211_v18, %v1207_v13 }
 0x453   : > { %v1213_v21 = vmul.f32 %v2056_v54, %v1212_v2 }
 0x455   : > { %1530 = vmatmul.msk.f32.gmra.mxu1 %vm340_vm1, %v1213_v21 }
 0x483   : > { %v984_v23 = vpop.f32.mrf.mxu0 }
 0x484   : > { %1304 = vrot.lane.b32.xlu1 %v984_v23, %s1691_s9 }
 0x48a   : > { %v760_v24 = vpop.f32.mrf.mxu1 }
 0x48b   : > { %v987_v27 = vpop.f32.mrf.mxu0 }
 0x48c   : > { %1290 = vrot.lane.b32.xlu1 %v728_v22, %s1690_s8 }
 0x492   : > { %v763_v26 = vpop.f32.mrf.mxu1 }
 0x49d   : > { %v1289_v35 = vpop.permute.xlu2 %1288 }
 0x49e   : > { %v1332_v10 = vsel %vm257_vm0, %v2132_v59, %v1289_v35 }
 0x4a2   : > { %v1019_v28 = vpop.f32.mrf.mxu1 }
 0x4a3   : > { %1308 = vrot.lane.b32.xlu2 %v1019_v28, %s1691_s9 }
 0x4a7   : > { %v1243_v29 = vpop.f32.mrf.mxu0 }
 0x4a8   : > { %1320 = vrot.lane.b32.xlu0 %v1243_v29, %s1692_s10 }
 0x4aa   : > { %v1022_v30 = vpop.f32.mrf.mxu1 }
 0x4ab   : > { %1310 = vrot.lane.b32.xlu2 %v1022_v30, %s1691_s9 }
 0x4af   : > { %v1246_v54 = vpop.f32.mrf.mxu0 }
 0x4b0   : > { %1306 = vrot.lane.b32.xlu0 %v987_v27, %s1691_s9  ;;  %1322 = vrot.lane.b32.xlu1 %v1246_v54, %s1692_s10 }
 0x4b8   : > { %1292 = vrot.lane.b32.xlu0 %v760_v24, %s1690_s8 }
 0x4c0   : > { %1294 = vrot.lane.b32.xlu0 %v763_v26, %s1690_s8 }
 0x4ca   : > { %v1278_v31 = vpop.f32.mrf.mxu1 }
 0x4cb   : > { %1324 = vrot.lane.b32.xlu1 %v1278_v31, %s1692_s10 }
 0x4d2   : > { %v1281_v32 = vpop.f32.mrf.mxu1 }
 0x4d3   : > { %1326 = vrot.lane.b32.xlu1 %v1281_v32, %s1692_s10 }
 0x4f6   : > { %v1305_v20 = vpop.permute.xlu1 %1304 }
 0x4f7   : > { %v1336_v58 = vsel %vm340_vm1, %v1332_v10, %v1305_v20 }
 0x4fd   : > { %v1309_v43 = vpop.permute.xlu2 %1308 }
 0x4fe   : > { %v1291_v38 = vpop.permute.xlu1 %1290 }
 0x4ff   : > { %v1333_v41 = vsel %vm257_vm0, %v1923_v63, %v1291_v38 }
 0x505   : > { %v1311_v25 = vpop.permute.xlu2 %1310 }
 0x51a   : > { %v1321_v39 = vpop.permute.xlu0 %1320 }
 0x51b   : > { %v1341_v46 = vsel %vm1340_vm10, %v1336_v58, %v1321_v39 }
 0x51c   : > { %1531 = vmatmul.msk.f32.vlgmr.msrb.gmra.mxu2 %vm1353_vm11, %v1341_v46 }
 0x522   : > { %v1307_v9 = vpop.permute.xlu0 %1306  ;;  %v1323_v47 = vpop.permute.xlu1 %1322 }
 0x523   : > { %v1337_v48 = vsel %vm340_vm1, %v1333_v41, %v1307_v9 }
 0x524   : > { %v1342_v49 = vsel %vm1340_vm10, %v1337_v48, %v1323_v47 }
 0x525   : > { %1532 = vmatmul.msk.f32.gmra.mxu2 %vm1353_vm11, %v1342_v49 }
 0x52a   : > { %v1293_v19 = vpop.permute.xlu0 %1292 }
 0x52b   : > { %v1334_v50 = vsel %vm257_vm0, %v501_v51, %v1293_v19 }
 0x52c   : > { %v1338_v57 = vsel %vm340_vm1, %v1334_v50, %v1309_v43 }
 0x532   : > { %v1295_v56 = vpop.permute.xlu0 %1294 }
 0x533   : > { %v1335_v63 = vsel %vm257_vm0, %v1897_v42, %v1295_v56 }
 0x534   : > { %v1339_v59 = vsel %vm340_vm1, %v1335_v63, %v1311_v25 }
 0x53d   : > { %v1325_v52 = vpop.permute.xlu1 %1324 }
 0x53e   : > { %v1343_v55 = vsel %vm1340_vm10, %v1338_v57, %v1325_v52 }
 0x53f   : > { %1533 = vmatmul.msk.f32.gmra.mxu2 %vm1353_vm11, %v1343_v55 }
 0x545   : > { %v1327_v45 = vpop.permute.xlu1 %1326 }
 0x546   : > { %v1344_v37 = vsel %vm1340_vm10, %v1339_v59, %v1327_v45 }
 0x547   : > { %1534 = vmatmul.msk.f32.gmra.mxu2 %vm1353_vm11, %v1344_v37 }
 0x59f   : > { %v1383_v3 = vpop.f32.mrf.mxu2 }
 0x5a0   : > { %v1384_v0 = vadd.f32 %v1606_v61, %v1383_v3 }
 0x5a2   : > { %1395 = vst.msk [vmem:[%s244_s26] sm:$0xff] %vm1353_vm11, %v1384_v0 }
 0x5a8   : > { %v1386_v42 = vpop.f32.mrf.mxu2 }
 0x5a9   : > { %v1387_v1 = vadd.f32 %v1606_v61, %v1386_v42 }
 0x5ab   : > { %1396 = vst.msk [vmem:[%s244_s26 + $0x8] sm:$0xff] %vm1353_vm11, %v1387_v1 }
 0x5c2   : > { %v1389_v14 = vpop.f32.mrf.mxu2 }
 0x5c3   : > { %v1390_v8 = vadd.f32 %v1606_v61, %v1389_v14 }
 0x5c5   : > { %1397 = vst.msk [vmem:[%s244_s26 + $0x10] sm:$0xff] %vm1353_vm11, %v1390_v8 }
 0x5ca   : > { %v1392_v5 = vpop.f32.mrf.mxu2 }
 0x5cb   : > { %v1393_v44 = vadd.f32 %v1606_v61, %v1392_v5 }
 0x5cd   : > { %1398 = vst.msk [vmem:[%s244_s26 + $0x18] sm:$0xff] %vm1353_vm11, %v1393_v44 }
 0x5ce PF: > { %s15_s18 = sadd.s32 1, %s1677_s18  }
 0x5cf   : > { %p12_p4 = scmp.ge.s32.totalorder %s15_s18, 6  }
 0x5d1   :  { %14 = sbr.rel (!%p12_p4) target bundleno = 1 (0x1), region = 76 }

// kernel: swin_block_forward.5
= control target key start
LH: loop header
LB: loop body
LE: loop exit
PB: predicated region body
PF: predicated region fallthrough
CT: control target
= control target key end

     0   :  { %s920_s27 = smov 0   ;;  %s1119_s0 = inlined_call_operand.vmem [shape: f32[128,32], index: 0, kind: input, shape index: {}]   ;;  %s1120_s1 = inlined_call_operand.vmem [shape: f32[128,32], index: 1, kind: input, shape index: {}]   ;;  %s1121_s2 = inlined_call_operand.vmem [shape: f32[32,64], index: 2, kind: input, shape index: {}]   ;;  %s1122_s3 = inlined_call_operand.vmem [shape: f32[1,64], index: 3, kind: input, shape index: {}]   ;;  %s1123_s4 = inlined_call_operand.vmem [shape: f32[64,32], index: 4, kind: input, shape index: {}]   ;;  %s1124_s5 = inlined_call_operand.vmem [shape: f32[1,32], index: 5, kind: input, shape index: {}]   ;;  %s1125_s6 = inlined_call_operand.vmem [shape: f32[1,32], index: 6, kind: input, shape index: {}]   ;;  %s1126_s7 = inlined_call_operand.vmem [shape: f32[1,32], index: 7, kind: input, shape index: {}]   ;;  %s1127_s8 = inlined_call_operand.vmem [shape: f32[128,32], index: 8, kind: output, shape index: {}]  }
   0x1 LB: > { %s794_s28 = sadd.s32 4294967295, %s872_s27   ;;  %p798_p0 = scmp.ge.s32.totalorder %s872_s27, 1  ;;  %s872_s27 = sphi %s920_s27, %s18_s27  }
   0x2   : > { %p274_p1 = scmp.lt.s32.totalorder %s872_s27, 5 }
   0x4   : > { %p275_p2 = pnand %p798_p0, %p274_p1 }
   0x5   : > { %s799_s29 = sshll.u32 (!%p275_p2), %s794_s28, 2 }
   0x6   : > { %278 = sbr.rel (%p275_p2) target bundleno = 628 (0x274), region = 52  ;;  %p314_p3 = scmp.lt.s32.totalorder (!%p275_p2), %s799_s29, 15 }
   0xb   : > { %s1131_s29 = smov (!%p314_p3, %s799_s29), 15  ;;  %vm343_vm0 = vcmask 261120   ;;  %v874_v16 = vmov 32.0   ;;  %v458_v43 = vld [vmem:[%s1121_s2 + $0x18] sm:$0xff]  ;;  %v457_v44 = vld [vmem:[%s1121_s2 + $0x10] sm:$0xff]  ;;  %v456_v45 = vld [vmem:[%s1121_s2 + $0x8] sm:$0xff] }
   0xc   : > { %s928_s30 = sshll.u32 %s1131_s29, 3  ;;  %840 = vrcp.f32 %v874_v16  ;;  %815 = vmatpush.msra.mxu3 %v458_v43  ;;  %487 = vmatpush.msra.mxu0 %v458_v43  ;;  %v455_v46 = vld [vmem:[%s1121_s2] sm:$0xff] }
   0xd   : > { %s317_s11 = scalar_lea.vmem %s1119_s0, %s928_s30  ;;  %s323_s14 = scalar_lea.vmem %s1120_s1, %s928_s30 }
   0xe   : > { %v334_v0 = vld [vmem:[%s317_s11 + $0x18] sm:$0xff]  ;;  %v332_v2 = vld [vmem:[%s317_s11 + $0x8] sm:$0xff]  ;;  %v331_v6 = vld [vmem:[%s317_s11] sm:$0xff]  ;;  %816 = vmatpush.msra.mxu3 %v457_v44  ;;  %488 = vmatpush.msra.mxu0 %v457_v44  ;;  %s329_s9 = scalar_lea.vmem %s1127_s8, %s928_s30 }
   0xf   : > { %v338_v1 = vld [vmem:[%s323_s14 + $0x18] sm:$0xff]  ;;  %v336_v4 = vld [vmem:[%s323_s14 + $0x8] sm:$0xff]  ;;  %v335_v7 = vld [vmem:[%s323_s14] sm:$0xff] }
  0x10   : > { %v938_v3 = vadd.f32 %v338_v1, %v334_v0  ;;  %v940_v5 = vadd.f32 %v336_v4, %v332_v2  ;;  %v333_v9 = vld [vmem:[%s317_s11 + $0x10] sm:$0xff]  ;;  %v946_v12 = vadd.f32 %v335_v7, %v331_v6  ;;  %817 = vmatpush.msra.mxu3 %v456_v45  ;;  %489 = vmatpush.msra.mxu0 %v456_v45 }
  0x11   : > { %v337_v10 = vld [vmem:[%s323_s14 + $0x10] sm:$0xff] }
  0x12   : > { %v353_v8 = vsel %vm343_vm0, %v938_v3, 0.0  ;;  %v347_v11 = vsel %vm343_vm0, %v940_v5, 0.0  ;;  %v948_v13 = vadd.f32 %v337_v10, %v333_v9  ;;  %v344_v14 = vsel %vm343_vm0, %v946_v12, 0.0  ;;  %v841_v17 = vpop.eup %840  ;;  %818 = vmatpush.msra.mxu3 %v455_v46  ;;  %490 = vmatpush.msra.mxu0 %v455_v46 }
  0x13   : > { %354 = vadd.xlane.f32.xlu1 %v353_v8  ;;  %348 = vadd.xlane.f32.xlu0 %v347_v11  ;;  %v357_v18 = vmul.f32 32.0, %v841_v17  ;;  %vm361_vm1 = vweird.f32 %v841_v17 }
  0x14   : > { %v350_v15 = vsel %vm343_vm0, %v948_v13, 0.0 }
  0x15   : > { %v358_v19 = vsub.f32 1.0, %v357_v18 }
  0x17   : > { %v359_v20 = vmul.f32 %v841_v17, %v358_v19  ;;  %v837_v19 = vld [vmem:[%s1126_s7] ss:$0 sm:$0xff] }
  0x19   : > { %v360_v21 = vadd.f32 %v841_v17, %v359_v20 }
  0x1b   : > { %345 = vadd.xlane.f32.xlu1 %v344_v14  ;;  %351 = vadd.xlane.f32.xlu0 %v350_v15  ;;  %v362_v22 = vsel %vm361_vm1, %v841_v17, %v360_v21  ;;  %v836_v14 = vld [vmem:[%s1125_s6] ss:$0 sm:$0xff] }
  0x86   : > { %v355_v23 = vpop.xlane.xlu1 %354  ;;  %v349_v25 = vpop.xlane.xlu0 %348 }
  0x87   : > { %v366_v24 = vmul.f32 %v362_v22, %v355_v23  ;;  %v364_v26 = vmul.f32 %v362_v22, %v349_v25 }
  0x89   : > { %v955_v27 = vsub.f32 %v938_v3, %v366_v24  ;;  %v958_v28 = vsub.f32 %v940_v5, %v364_v26 }
  0x8b   : > { %v374_v29 = vmul.f32 %v955_v27, %v955_v27  ;;  %v372_v30 = vmul.f32 %v958_v28, %v958_v28 }
  0x8d   : > { %v384_v31 = vsel %vm343_vm0, %v374_v29, 0.0  ;;  %v378_v32 = vsel %vm343_vm0, %v372_v30, 0.0 }
  0x8e   : > { %385 = vadd.xlane.f32.xlu0 %v384_v31  ;;  %v346_v33 = vpop.xlane.xlu1 %345  ;;  %379 = vadd.xlane.f32.xlu2 %v378_v32  ;;  %v352_v34 = vpop.xlane.xlu0 %351 }
  0x8f   : > { %v363_v35 = vmul.f32 %v362_v22, %v346_v33  ;;  %v365_v36 = vmul.f32 %v362_v22, %v352_v34 }
  0x91   : > { %v967_v37 = vsub.f32 %v946_v12, %v363_v35  ;;  %v970_v38 = vsub.f32 %v948_v13, %v365_v36 }
  0x93   : > { %v371_v39 = vmul.f32 %v967_v37, %v967_v37  ;;  %v373_v40 = vmul.f32 %v970_v38, %v970_v38 }
  0x95   : > { %v375_v41 = vsel %vm343_vm0, %v371_v39, 0.0  ;;  %v381_v42 = vsel %vm343_vm0, %v373_v40, 0.0 }
  0x96   : > { %376 = vadd.xlane.f32.xlu1 %v375_v41  ;;  %382 = vadd.xlane.f32.xlu2 %v381_v42 }
 0x101   : > { %v386_v47 = vpop.xlane.xlu0 %385  ;;  %v380_v48 = vpop.xlane.xlu2 %379 }
 0x102   : > { %v390_v49 = vmul.f32 %v386_v47, %v362_v22  ;;  %v388_v50 = vmul.f32 %v380_v48, %v362_v22 }
 0x104   : > { %v394_v51 = vadd.f32 1e-05, %v390_v49  ;;  %v392_v52 = vadd.f32 1e-05, %v388_v50  ;;  %v671_v50 = vld [vmem:[%s1123_s4 + $0x38] sm:$0xff] }
 0x105   : > { %697 = vmatpush.msra.mxu1 %v671_v50  ;;  %819 = vmatpush.msra.mxu2 %v671_v50 }
 0x106   : > { %842 = vrsqrt.f32 %v394_v51  ;;  %vm411_vm3 = vweird.f32 %v392_v52  ;;  %vm431_vm8 = vweird.f32 %v394_v51 }
 0x107   : > { %844 = vrsqrt.f32 %v392_v52 }
 0x109   : > { %v377_v53 = vpop.xlane.xlu1 %376  ;;  %v383_v54 = vpop.xlane.xlu2 %382 }
 0x10a   : > { %v387_v55 = vmul.f32 %v377_v53, %v362_v22  ;;  %v389_v56 = vmul.f32 %v383_v54, %v362_v22 }
 0x10c   : > { %v843_v57 = vpop.eup %842  ;;  %v391_v58 = vadd.f32 1e-05, %v387_v55  ;;  %v393_v60 = vadd.f32 1e-05, %v389_v56  ;;  %v669_v55 = vld [vmem:[%s1123_s4 + $0x28] sm:$0xff] }
 0x10d   : > { %v845_v59 = vpop.eup %844  ;;  %v426_v62 = vmul.f32 %v843_v57, %v394_v51  ;;  %vm432_vm9 = vweird.f32 %v843_v57  ;;  %v670_v51 = vld [vmem:[%s1123_s4 + $0x30] sm:$0xff] }
 0x10e   : > { %v406_v61 = vmul.f32 %v845_v59, %v392_v52  ;;  %846 = vrsqrt.f32 %v391_v58  ;;  %vm412_vm2 = vweird.f32 %v845_v59  ;;  %vm401_vm5 = vweird.f32 %v391_v58  ;;  %vm433_vm13 = vmor %vm431_vm8, %vm432_vm9  ;;  %698 = vmatpush.msra.mxu1 %v670_v51  ;;  %820 = vmatpush.msra.mxu2 %v670_v51 }
 0x10f   : > { %848 = vrsqrt.f32 %v393_v60  ;;  %v427_v1 = vmul.f32 %v843_v57, %v426_v62  ;;  %vm413_vm4 = vmor %vm411_vm3, %vm412_vm2  ;;  %vm421_vm10 = vweird.f32 %v393_v60  ;;  %v666_v62 = vld [vmem:[%s1123_s4 + $0x10] sm:$0xff] }
 0x110   : > { %v407_v63 = vmul.f32 %v845_v59, %v406_v61  ;;  %699 = vmatpush.msra.mxu1 %v669_v55  ;;  %821 = vmatpush.msra.mxu2 %v669_v55 }
 0x111   : > { %v428_v9 = vmul.f32 0.5, %v427_v1  ;;  %v665_v1 = vld [vmem:[%s1123_s4 + $0x8] sm:$0xff] }
 0x112   : > { %v408_v0 = vmul.f32 0.5, %v407_v63 }
 0x113   : > { %v429_v20 = vsub.f32 1.5, %v428_v9  ;;  %v664_v9 = vld [vmem:[%s1123_s4] sm:$0xff] }
 0x114   : > { %v847_v2 = vpop.eup %846  ;;  %v409_v4 = vsub.f32 1.5, %v408_v0 }
 0x115   : > { %v849_v6 = vpop.eup %848  ;;  %v396_v7 = vmul.f32 %v847_v2, %v391_v58  ;;  %vm402_vm6 = vweird.f32 %v847_v2  ;;  %v430_v29 = vmul.f32 %v843_v57, %v429_v20 }
 0x116   : > { %v410_v8 = vmul.f32 %v845_v59, %v409_v4  ;;  %v416_v10 = vmul.f32 %v849_v6, %v393_v60  ;;  %vm422_vm7 = vweird.f32 %v849_v6  ;;  %vm403_vm11 = vmor %vm401_vm5, %vm402_vm6  ;;  %v667_v60 = vld [vmem:[%s1123_s4 + $0x18] sm:$0xff] }
 0x117   : > { %v397_v11 = vmul.f32 %v847_v2, %v396_v7  ;;  %vm423_vm12 = vmor %vm421_vm10, %vm422_vm7  ;;  %v434_v34 = vsel %vm433_vm13, %v843_v57, %v430_v29 }
 0x118   : > { %v414_v15 = vsel %vm413_vm4, %v845_v59, %v410_v8  ;;  %v417_v16 = vmul.f32 %v849_v6, %v416_v10  ;;  %v438_v41 = vmul.f32 %v434_v34, %v955_v27  ;;  %v668_v59 = vld [vmem:[%s1123_s4 + $0x20] sm:$0xff] }
 0x119   : > { %v398_v17 = vmul.f32 0.5, %v397_v11  ;;  %v436_v18 = vmul.f32 %v414_v15, %v958_v28  ;;  %700 = vmatpush.msra.mxu1 %v668_v59  ;;  %822 = vmatpush.msra.mxu2 %v668_v59 }
 0x11a   : > { %v418_v21 = vmul.f32 0.5, %v417_v16  ;;  %v446_v42 = vmul.f32 %v836_v14, %v438_v41 }
 0x11b   : > { %v399_v22 = vsub.f32 1.5, %v398_v17  ;;  %v444_v23 = vmul.f32 %v836_v14, %v436_v18  ;;  %701 = vmatpush.msra.mxu1 %v667_v60  ;;  %823 = vmatpush.msra.mxu2 %v667_v60 }
 0x11c   : > { %v419_v24 = vsub.f32 1.5, %v418_v21  ;;  %v454_v43 = vadd.f32 %v837_v19, %v446_v42 }
 0x11d   : > { %v400_v25 = vmul.f32 %v847_v2, %v399_v22  ;;  %v452_v26 = vadd.f32 %v837_v19, %v444_v23  ;;  %702 = vmatpush.msra.mxu1 %v666_v62  ;;  %824 = vmatpush.msra.mxu2 %v666_v62 }
 0x11e   : > { %v420_v30 = vmul.f32 %v849_v6, %v419_v24 }
 0x11f   : > { %v404_v28 = vsel %vm403_vm11, %v847_v2, %v400_v25  ;;  %806 = vmatmul.msk.f32.vlgmr.msra.gmra.mxu3 %vm343_vm0, %v452_v26  ;;  %703 = vmatpush.msra.mxu1 %v665_v1 }
 0x120   : > { %v424_v31 = vsel %vm423_vm12, %v849_v6, %v420_v30  ;;  %v435_v32 = vmul.f32 %v404_v28, %v967_v37  ;;  %v838_v37 = vld [vmem:[%s1122_s3] ss:$0 sm:$0xff]  ;;  %825 = vmatpush.msra.mxu2 %v665_v1 }
 0x121   : > { %v437_v33 = vmul.f32 %v424_v31, %v970_v38  ;;  %704 = vmatpush.msra.mxu1 %v664_v9 }
 0x122   : > { %v443_v35 = vmul.f32 %v836_v14, %v435_v32  ;;  %826 = vmatpush.msra.mxu2 %v664_v9 }
 0x123   : > { %v445_v36 = vmul.f32 %v836_v14, %v437_v33 }
 0x124   : > { %v451_v39 = vadd.f32 %v837_v19, %v443_v35 }
 0x125   : > { %v453_v40 = vadd.f32 %v837_v19, %v445_v36 }
 0x126   : > { %805 = vmatmul.msk.f32.vlgmr.msra.gmra.mxu0 %vm343_vm0, %v451_v39 }
 0x127   : > { %807 = vmatmul.msk.f32.gmra.mxu3 %vm343_vm0, %v453_v40 }
 0x12f   : > { %808 = vmatmul.msk.f32.gmra.mxu3 %vm343_vm0, %v454_v43 }
 0x1a2   : > { %v495_v38 = vpop.f32.mrf.mxu3 }
 0x1a3   : > { %v1007_v44 = vadd.f32 %v838_v37, %v495_v38  ;;  %v492_v45 = vpop.f32.mrf.mxu0 }
 0x1a4   : > { %v1009_v46 = vadd.f32 %v838_v37, %v492_v45 }
 0x1a5   : > { %v1012_v27 = vmul.f32 0.70710677, %v1007_v44 }
 0x1a6   : > { %v1015_v47 = vmul.f32 0.70710677, %v1009_v46 }
 0x1a7   : > { %v1018_v48 = vand.u32 2147483647, %v1012_v27 }
 0x1a8   : > { %v1021_v49 = vand.u32 2147483647, %v1015_v47 }
 0x1a9   : > { %v517_v52 = vmul.f32 0.3275911, %v1018_v48  ;;  %v621_v29 = vsub.f32 0.0, %v1018_v48 }
 0x1aa   : > { %v516_v53 = vmul.f32 0.3275911, %v1021_v49  ;;  %v498_v54 = vpop.f32.mrf.mxu3  ;;  %v620_v32 = vsub.f32 0.0, %v1021_v49 }
 0x1ab   : > { %v521_v56 = vadd.f32 1.0, %v517_v52  ;;  %v1034_v58 = vadd.f32 %v838_v37, %v498_v54  ;;  %v625_v40 = vmul.f32 %v621_v29, %v1018_v48 }
 0x1ac   : > { %v520_v57 = vadd.f32 1.0, %v516_v53  ;;  %v624_v43 = vmul.f32 %v620_v32, %v1021_v49 }
 0x1ad   : > { %850 = vrcp.f32 %v521_v56  ;;  %v1043_v61 = vmul.f32 0.70710677, %v1034_v58  ;;  %v550_v19 = vand.u32 2147483648, %v521_v56  ;;  %v548_v20 = vand.u32 2147483647, %v521_v56 }
 0x1ae   : > { %852 = vrcp.f32 %v520_v57  ;;  %v535_v22 = vand.u32 2147483648, %v520_v57  ;;  %vm544_vm15 = vweird.f32 %v521_v56  ;;  %v533_v24 = vand.u32 2147483647, %v520_v57 }
 0x1af   : > { %v1049_v63 = vand.u32 2147483647, %v1043_v61  ;;  %v551_v31 = vor.u32 1.1754944e-38, %v550_v19  ;;  %vm529_vm3 = vweird.f32 %v520_v57  ;;  %vm549_vm5 = vcmp.eq.f32.partialorder %v548_v20, 8.507059e+37 }
 0x1b0   : > { %v536_v34 = vor.u32 1.1754944e-38, %v535_v22  ;;  %vm534_vm6 = vcmp.eq.f32.partialorder %v533_v24, 8.507059e+37  ;;  %v630_v55 = vmul.f32 1.442695, %v625_v40 }
 0x1b1   : > { %v518_v8 = vmul.f32 0.3275911, %v1049_v63  ;;  %v622_v62 = vsub.f32 0.0, %v1049_v63 }
 0x1b2   : > { %v501_v0 = vpop.f32.mrf.mxu3 }
 0x1b3   : > { %v851_v2 = vpop.eup %850  ;;  %v1054_v4 = vadd.f32 %v838_v37, %v501_v0  ;;  %v522_v15 = vadd.f32 1.0, %v518_v8  ;;  %v626_v22 = vmul.f32 %v622_v62, %v1049_v63 }
 0x1b4   : > { %v853_v6 = vpop.eup %852  ;;  %v540_v7 = vmul.f32 %v851_v2, %v521_v56  ;;  %vm545_vm14 = vweird.f32 %v851_v2 }
 0x1b5   : > { %v525_v10 = vmul.f32 %v853_v6, %v520_v57  ;;  %v1061_v11 = vmul.f32 0.70710677, %v1054_v4  ;;  %854 = vrcp.f32 %v522_v15  ;;  %vm530_vm1 = vweird.f32 %v853_v6  ;;  %vm1067_vm2 = vmor %vm544_vm15, %vm545_vm14 }
 0x1b6   : > { %v541_v14 = vsub.f32 1.0, %v540_v7  ;;  %vm531_vm4 = vmor %vm529_vm3, %vm530_vm1  ;;  %v563_v50 = vand.u32 2147483647, %v522_v15  ;;  %v565_v51 = vand.u32 2147483648, %v522_v15  ;;  %v628_v57 = vmul.f32 1.442695, %v624_v43 }
 0x1b7   : > { %v526_v16 = vsub.f32 1.0, %v525_v10  ;;  %v1064_v17 = vand.u32 2147483647, %v1061_v11  ;;  %vm559_vm8 = vweird.f32 %v522_v15  ;;  %v632_v40 = vmul.f32 1.442695, %v626_v22 }
 0x1b8   : > { %v542_v18 = vmul.f32 %v851_v2, %v541_v14  ;;  %vm564_vm9 = vcmp.eq.f32.partialorder %v563_v50, 8.507059e+37  ;;  %v566_v0 = vor.u32 1.1754944e-38, %v565_v51  ;;  %vm644_vm15 = vcmp.ge.f32.partialorder %v1015_v47, 0.0 }
 0x1b9   : > { %v527_v21 = vmul.f32 %v853_v6, %v526_v16  ;;  %v519_v23 = vmul.f32 0.3275911, %v1064_v17  ;;  %vm676_vm1 = vcmask 523264   ;;  %vm646_vm3 = vcmp.ge.f32.partialorder %v1043_v61, 0.0 }
 0x1ba   : > { %v543_v25 = vadd.f32 %v851_v2, %v542_v18 }
 0x1bb   : > { %v1072_v30 = vadd.f32 1.0, %v519_v23  ;;  %v528_v28 = vadd.f32 %v853_v6, %v527_v21  ;;  %v855_v35 = vpop.eup %854 }
 0x1bc   : > { %v547_v33 = vsel %vm1067_vm2, %v851_v2, %v543_v25  ;;  %v555_v41 = vmul.f32 %v855_v35, %v522_v15  ;;  %vm560_vm7 = vweird.f32 %v855_v35  ;;  %vm645_vm2 = vcmp.ge.f32.partialorder %v1012_v27, 0.0 }
 0x1bd   : > { %856 = vrcp.f32 %v1072_v30  ;;  %v532_v36 = vsel %vm531_vm4, %v853_v6, %v528_v28  ;;  %v552_v39 = vsel %vm549_vm5, %v551_v31, %v547_v33  ;;  %vm561_vm10 = vmor %vm559_vm8, %vm560_vm7  ;;  %v578_v7 = vand.u32 2147483647, %v1072_v30 }
 0x1be   : > { %v537_v42 = vsel %vm534_vm6, %v536_v34, %v532_v36  ;;  %v585_v38 = vmul.f32 1.0614054, %v552_v39  ;;  %v556_v45 = vsub.f32 1.0, %v555_v41  ;;  %v580_v8 = vand.u32 2147483648, %v1072_v30 }
 0x1bf   : > { %v584_v37 = vmul.f32 1.0614054, %v537_v42  ;;  %858 = vpow2.f32 %v630_v55  ;;  %vm574_vm12 = vweird.f32 %v1072_v30  ;;  %vm579_vm14 = vcmp.eq.f32.partialorder %v578_v7, 8.507059e+37 }
 0x1c0   : > { %v589_v53 = vadd.f32 -1.4531521, %v585_v38  ;;  %v557_v56 = vmul.f32 %v855_v35, %v556_v45  ;;  %860 = vpow2.f32 %v628_v57  ;;  %v581_v23 = vor.u32 1.1754944e-38, %v580_v8 }
 0x1c1   : > { %v588_v52 = vadd.f32 -1.4531521, %v584_v37  ;;  %v623_v28 = vsub.f32 0.0, %v1064_v17  ;;  %862 = vpow2.f32 %v632_v40  ;;  %vm647_vm4 = vcmp.ge.f32.partialorder %v1061_v11, 0.0 }
 0x1c2   : > { %v593_v48 = vmul.f32 %v589_v53, %v552_v39  ;;  %v558_v49 = vadd.f32 %v855_v35, %v557_v56 }
 0x1c3   : > { %v857_v54 = vpop.eup %856  ;;  %v592_v60 = vmul.f32 %v588_v52, %v537_v42  ;;  %v627_v38 = vmul.f32 %v623_v28, %v1064_v17  ;;  %v504_v17 = vmul.f32 0.5, %v1009_v46 }
 0x1c4   : > { %v570_v59 = vmul.f32 %v857_v54, %v1072_v30  ;;  %v597_v6 = vadd.f32 1.4214138, %v593_v48  ;;  %vm575_vm11 = vweird.f32 %v857_v54  ;;  %v562_v9 = vsel %vm561_vm10, %v855_v35, %v558_v49 }
 0x1c5   : > { %v596_v2 = vadd.f32 1.4214138, %v592_v60  ;;  %v567_v16 = vsel %vm564_vm9, %v566_v0, %v562_v9  ;;  %vm576_vm13 = vmor %vm574_vm12, %vm575_vm11  ;;  %v859_v35 = vpop.eup %858  ;;  %v634_v57 = vmul.f32 1.442695, %v627_v38 }
 0x1c6   : > { %v571_v1 = vsub.f32 1.0, %v570_v59  ;;  %v601_v18 = vmul.f32 %v597_v6, %v552_v39  ;;  %v586_v15 = vmul.f32 1.0614054, %v567_v16  ;;  %v861_v37 = vpop.eup %860 }
 0x1c7   : > { %v600_v14 = vmul.f32 %v596_v2, %v537_v42  ;;  %864 = vpow2.f32 %v634_v57  ;;  %v863_v2 = vpop.eup %862 }
 0x1c8   : > { %v572_v10 = vmul.f32 %v857_v54, %v571_v1  ;;  %v605_v20 = vadd.f32 -0.28449672, %v601_v18  ;;  %v590_v24 = vadd.f32 -1.4531521, %v586_v15 }
 0x1c9   : > { %v604_v19 = vadd.f32 -0.28449672, %v600_v14 }
 0x1ca   : > { %v573_v21 = vadd.f32 %v857_v54, %v572_v10  ;;  %v609_v26 = vmul.f32 %v605_v20, %v552_v39  ;;  %v594_v31 = vmul.f32 %v590_v24, %v567_v16 }
 0x1cb   : > { %v608_v25 = vmul.f32 %v604_v19, %v537_v42 }
 0x1cc   : > { %v577_v29 = vsel %vm576_vm13, %v857_v54, %v573_v21  ;;  %v613_v30 = vadd.f32 0.2548296, %v609_v26  ;;  %v598_v36 = vadd.f32 1.4214138, %v594_v31  ;;  %v506_v21 = vmul.f32 0.5, %v1034_v58 }
 0x1cd   : > { %v582_v32 = vsel %vm579_vm14, %v581_v23, %v577_v29  ;;  %v612_v33 = vadd.f32 0.2548296, %v608_v25  ;;  %v865_v18 = vpop.eup %864  ;;  %v507_v29 = vmul.f32 0.5, %v1054_v4  ;;  %v839_v58 = vld [vmem:[%s1124_s5] ss:$0 sm:$0xff] }
 0x1ce   : > { %v587_v34 = vmul.f32 1.0614054, %v582_v32  ;;  %v617_v63 = vmul.f32 %v613_v30, %v552_v39  ;;  %v602_v45 = vmul.f32 %v598_v36, %v567_v16 }
 0x1cf   : > { %v616_v41 = vmul.f32 %v612_v33, %v537_v42 }
 0x1d0   : > { %v591_v43 = vadd.f32 -1.4531521, %v587_v34  ;;  %v637_v51 = vmul.f32 %v859_v35, %v617_v63  ;;  %v606_v53 = vadd.f32 -0.28449672, %v602_v45 }
 0x1d1   : > { %v636_v50 = vmul.f32 %v861_v37, %v616_v41 }
 0x1d2   : > { %v595_v52 = vmul.f32 %v591_v43, %v582_v32  ;;  %v641_v55 = vsub.f32 1.0, %v637_v51  ;;  %v610_v59 = vmul.f32 %v606_v53, %v567_v16 }
 0x1d3   : > { %v640_v54 = vsub.f32 1.0, %v636_v50 }
 0x1d4   : > { %v599_v56 = vadd.f32 1.4214138, %v595_v52  ;;  %v614_v39 = vadd.f32 0.2548296, %v610_v59  ;;  %v649_v62 = vsub.f32 0.0, %v641_v55 }
 0x1d5   : > { %v648_v60 = vsub.f32 0.0, %v640_v54 }
 0x1d6   : > { %v603_v48 = vmul.f32 %v599_v56, %v582_v32  ;;  %v618_v1 = vmul.f32 %v614_v39, %v567_v16  ;;  %v653_v9 = vsel %vm645_vm2, %v641_v55, %v649_v62  ;;  %v505_v16 = vmul.f32 0.5, %v1007_v44 }
 0x1d7   : > { %v652_v42 = vsel %vm644_vm15, %v640_v54, %v648_v60  ;;  %v657_v19 = vadd.f32 1.0, %v653_v9 }
 0x1d8   : > { %v607_v49 = vadd.f32 -0.28449672, %v603_v48  ;;  %v656_v0 = vadd.f32 1.0, %v652_v42  ;;  %v638_v8 = vmul.f32 %v863_v2, %v618_v1 }
 0x1d9   : > { %v661_v23 = vmul.f32 %v657_v19, %v505_v16 }
 0x1da   : > { %v611_v6 = vmul.f32 %v607_v49, %v582_v32  ;;  %v660_v7 = vmul.f32 %v656_v0, %v504_v17  ;;  %v642_v47 = vsub.f32 1.0, %v638_v8 }
 0x1dc   : > { %v615_v10 = vadd.f32 0.2548296, %v611_v6  ;;  %809 = vmatmul.msk.f32.vlgmr.msra.gmra.mxu1 %vm676_vm1, %v660_v7  ;;  %v650_v15 = vsub.f32 0.0, %v642_v47 }
 0x1de   : > { %v619_v14 = vmul.f32 %v615_v10, %v582_v32  ;;  %v654_v20 = vsel %vm646_vm3, %v642_v47, %v650_v15 }
 0x1df   : > { %v658_v27 = vadd.f32 1.0, %v654_v20 }
 0x1e0   : > { %v639_v46 = vmul.f32 %v865_v18, %v619_v14 }
 0x1e1   : > { %v662_v24 = vmul.f32 %v658_v27, %v506_v21 }
 0x1e2   : > { %v643_v22 = vsub.f32 1.0, %v639_v46 }
 0x1e3   : > { %811 = vmatmul.msk.f32.vlgmr.msra.gmra.mxu2 %vm676_vm1, %v662_v24 }
 0x1e4   : > { %v651_v25 = vsub.f32 0.0, %v643_v22  ;;  %810 = vmatmul.msk.f32.gmra.mxu1 %vm676_vm1, %v661_v23 }
 0x1e6   : > { %v655_v26 = vsel %vm647_vm4, %v643_v22, %v651_v25 }
 0x1e7   : > { %v659_v61 = vadd.f32 1.0, %v655_v26 }
 0x1e9   : > { %v663_v44 = vmul.f32 %v659_v61, %v507_v29 }
 0x1eb   : > { %812 = vmatmul.msk.f32.gmra.mxu2 %vm676_vm1, %v663_v44 }
 0x259   : > { %v706_v28 = vpop.f32.mrf.mxu1 }
 0x25a   : > { %v707_v31 = vadd.f32 %v839_v58, %v706_v28 }
 0x25c   : > { %v718_v11 = vadd.f32 %v707_v31, %v946_v12 }
 0x25e   : > { %722 = vst.msk [vmem:[%s329_s9] sm:$0xff] %vm343_vm0, %v718_v11 }
 0x261   : > { %v709_v32 = vpop.f32.mrf.mxu1 }
 0x262   : > { %v710_v33 = vadd.f32 %v839_v58, %v709_v32 }
 0x264   : > { %v719_v4 = vadd.f32 %v710_v33, %v940_v5 }
 0x266   : > { %723 = vst.msk [vmem:[%s329_s9 + $0x8] sm:$0xff] %vm343_vm0, %v719_v4  ;;  %v712_v30 = vpop.f32.mrf.mxu2 }
 0x267   : > { %v713_v34 = vadd.f32 %v839_v58, %v712_v30 }
 0x269   : > { %v720_v35 = vadd.f32 %v713_v34, %v948_v13 }
 0x26b   : > { %724 = vst.msk [vmem:[%s329_s9 + $0x10] sm:$0xff] %vm343_vm0, %v720_v35 }
 0x26e   : > { %v715_v36 = vpop.f32.mrf.mxu2 }
 0x26f   : > { %v716_v40 = vadd.f32 %v839_v58, %v715_v36 }
 0x271   : > { %v721_v41 = vadd.f32 %v716_v40, %v938_v3 }
 0x273   : > { %725 = vst.msk [vmem:[%s329_s9 + $0x18] sm:$0xff] %vm343_vm0, %v721_v41 }
 0x274 PF: > { %s18_s27 = sadd.s32 1, %s872_s27  }
 0x275   : > { %p15_p4 = scmp.ge.s32.totalorder %s18_s27, 6  }
 0x277   :  { %17 = sbr.rel (!%p15_p4) target bundleno = 1 (0x1), region = 85 }

</bundles_post_ra>
